<compile_context>
chip_gen: v7x
topology: tpu7x:2x2x1
jax: 0.10.0
libtpu: 0.0.40
codegen_flags: <defaults>
</compile_context>

<pallas_src>
import jax
import jax.numpy as jnp
from jax import lax
from jax.experimental import pallas as pl
from jax.experimental.pallas import tpu as pltpu

EMBED_DIM = 32
NUM_HEADS = 2
HEAD_DIM = EMBED_DIM // NUM_HEADS


def ret_attn_kernel(x_ref, w_in_ref, misc_ref, mask_ref, out_ref):
    """One grid step = one block of BLK independent (q,k,v) problems.

    x_ref    : (BLK*(L+2S), 3E) block-diagonal rows:
                 rows [0 : BLK*L)            q in lanes [0:E)
                 rows [BLK*L : BLK*(L+S))    k in lanes [E:2E)
                 rows [BLK*(L+S) : ...)      v in lanes [2E:3E)
    w_in_ref : (3E, E)  [Wq^T*scale ; Wk^T ; Wv^T]
    misc_ref : (8, BLK*L) row0[:E]=bq*scale, row1[:E]=w_fused (= wnl@Wo),
               row2 = b_fused broadcast (= wnl.bo + wnl.Wo.bv)
    mask_ref : (BLK*L, BLK*S) additive mask: 0 on each problem's block, -1e30 off
    out_ref  : (1, BLK*L) lane-dense fused output row
    """
    E = w_in_ref.shape[1]
    QL = out_ref.shape[1]            # BLK * L
    KS = mask_ref.shape[1]           # BLK * S
    assert x_ref.shape[0] == QL + 2 * KS

    # Single fused in-projection MXU pass for all BLK problems (K = 3E = 96).
    proj = jnp.dot(x_ref[...], w_in_ref[...],
                   preferred_element_type=jnp.float32)        # (QL+2*KS, E)

    qp = proj[0:QL, :] + misc_ref[0:1, 0:E]     # + bq*scale (scale pre-folded)
    kp = proj[QL:QL + KS, :]                    # bk dropped: softmax-invariant
    vp = proj[QL + KS:QL + 2 * KS, :]           # bv folded into b_fused

    contract_last = (((1,), (1,)), ((), ()))
    mask = mask_ref[...]
    out_row = misc_ref[2:3, :]                  # (1, QL) b_fused row

    for h in range(NUM_HEADS):                  # static unroll (2 heads)
        sl = slice(h * HEAD_DIM, (h + 1) * HEAD_DIM)
        # Block-diagonal scores for all BLK problems at once: (QL, KS).
        s = lax.dot_general(qp[:, sl], kp[:, sl], contract_last,
                            preferred_element_type=jnp.float32) + mask
        m = jnp.max(s, axis=-1, keepdims=True)
        p = jnp.exp(s - m)
        denom = jnp.sum(p, axis=-1, keepdims=True)
        p = p * pl.reciprocal(denom, approx=True)   # EUP slot; VPU stays free
        # Fold V-head with the fused (out_proj . Linear(E,1)) row:
        #   vw[s] = v_h[s] . w_fused_h   -> (1, KS), lane-dense
        vw = lax.dot_general(misc_ref[1:2, sl], vp[:, sl], contract_last,
                             preferred_element_type=jnp.float32)
        # out += P_h @ vw^T  -> (1, QL); no (L, E) head concat ever built.
        out_row = out_row + lax.dot_general(vw, p, contract_last,
                                            preferred_element_type=jnp.float32)

    out_ref[...] = out_row


def ret_attn_forward_batched(query, key, value, params):
    """query: (B, L, E), key/value: (B, S, E) -> (B, L).

    B independent problems (the PyTorch module applied B times) fused into one
    pallas_call with a 'parallel' grid over blocks of BLK problems.
    """
    B, L, E = query.shape
    S = key.shape[1]
    assert E == EMBED_DIM
    assert 128 % L == 0, "packing assumes L divides 128 (lane-dense output)"
    blk = 128 // L                       # problems per grid step
    assert blk * L >= E

    scale = 1.0 / jnp.sqrt(jnp.float32(HEAD_DIM))
    nblocks = -(-B // blk)
    bp = nblocks * blk
    pad = bp - B

    q = jnp.pad(query.astype(jnp.float32), ((0, pad), (0, 0), (0, 0)))
    k = jnp.pad(key.astype(jnp.float32), ((0, pad), (0, 0), (0, 0)))
    v = jnp.pad(value.astype(jnp.float32), ((0, pad), (0, 0), (0, 0)))

    # Block-diagonal packing: q/k/v in disjoint lane blocks so the fused
    # in-projection leaves qp/kp/vp as sublane slices at lane offset 0.
    zq = jnp.zeros((nblocks, blk * L, E), jnp.float32)
    zk = jnp.zeros((nblocks, blk * S, E), jnp.float32)
    q_rows = jnp.concatenate([q.reshape(nblocks, blk * L, E), zq, zq], axis=-1)
    k_rows = jnp.concatenate([zk, k.reshape(nblocks, blk * S, E), zk], axis=-1)
    v_rows = jnp.concatenate([zk, zk, v.reshape(nblocks, blk * S, E)], axis=-1)
    x = jnp.concatenate([q_rows, k_rows, v_rows], axis=1)
    x = x.reshape(nblocks * blk * (L + 2 * S), 3 * E)

    wq = params["in_proj_weight"][0:E]
    wk = params["in_proj_weight"][E:2 * E]
    wv = params["in_proj_weight"][2 * E:3 * E]
    bq = params["in_proj_bias"][0:E]
    bv = params["in_proj_bias"][2 * E:3 * E]
    wo = params["out_proj_weight"]               # (E, E)
    bo = params["out_proj_bias"]                 # (E,)
    wnl = params["nl_weight"]                    # (1, E)

    w_in = jnp.concatenate([wq.T * scale, wk.T, wv.T], axis=0)   # (3E, E)
    w_fused = (wnl @ wo)[0]                                      # (E,)
    b_fused = jnp.dot(wnl[0], bo) + jnp.dot(w_fused, bv)         # scalar
    misc = jnp.zeros((8, blk * L), jnp.float32)
    misc = misc.at[0, 0:E].set(bq * scale)
    misc = misc.at[1, 0:E].set(w_fused)
    misc = misc.at[2, :].set(b_fused)

    # Additive cross-problem mask: 0 on each problem's (L, S) block, -1e30 off.
    qi = jnp.arange(blk * L) // L
    ki = jnp.arange(blk * S) // S
    mask = jnp.where(qi[:, None] == ki[None, :], 0.0, -1e30).astype(jnp.float32)

    out = pl.pallas_call(
        ret_attn_kernel,
        out_shape=jax.ShapeDtypeStruct((1, nblocks * blk * L), jnp.float32),
        grid=(nblocks,),
        in_specs=[
            pl.BlockSpec((blk * (L + 2 * S), 3 * E), lambda i: (i, 0)),  # x
            pl.BlockSpec((3 * E, E), lambda i: (0, 0)),                  # w_in
            pl.BlockSpec((8, blk * L), lambda i: (0, 0)),                # misc
            pl.BlockSpec((blk * L, blk * S), lambda i: (0, 0)),          # mask
        ],
        out_specs=pl.BlockSpec((1, blk * L), lambda i: (0, i)),
        compiler_params=pltpu.CompilerParams(
            dimension_semantics=("parallel",)),   # v7x: split blocks over 2 TCs
    )(x, w_in, misc, mask)

    return out.reshape(bp, L)[:B]


def ret_attn_forward(query, key, value, params):
    """query: (L, 1, E), key/value: (S, 1, E) -> (L,). Torch-module signature."""
    L, N, E = query.shape
    assert N == 1, "the final .view(L) in the PyTorch module requires batch == 1"
    out = ret_attn_forward_batched(jnp.transpose(query, (1, 0, 2)),
                                   jnp.transpose(key, (1, 0, 2)),
                                   jnp.transpose(value, (1, 0, 2)), params)
    return out.reshape(L)


def ret_attn_reference_single(q2, k2, v2, params):
    """Pure-JAX reference for one problem, mirrors torch.nn.MultiheadAttention."""
    E = q2.shape[-1]
    wq = params["in_proj_weight"][0:E]
    wk = params["in_proj_weight"][E:2 * E]
    wv = params["in_proj_weight"][2 * E:3 * E]
    bq = params["in_proj_bias"][0:E]
    bk = params["in_proj_bias"][E:2 * E]
    bv = params["in_proj_bias"][2 * E:3 * E]
    qp = q2 @ wq.T + bq
    kp = k2 @ wk.T + bk
    vp = v2 @ wv.T + bv
    outs = []
    for h in range(NUM_HEADS):
        sl = slice(h * HEAD_DIM, (h + 1) * HEAD_DIM)
        s = (qp[:, sl] @ kp[:, sl].T) / jnp.sqrt(jnp.float32(HEAD_DIM))
        p = jax.nn.softmax(s, axis=-1)
        outs.append(p @ vp[:, sl])
    o = jnp.concatenate(outs, axis=-1)
    attn_out = o @ params["out_proj_weight"].T + params["out_proj_bias"]
    return (attn_out @ params["nl_weight"].T)[:, 0]


def init_params(key, embed_dim):
    ks = jax.random.split(key, 5)
    scale = 1.0 / jnp.sqrt(jnp.float32(embed_dim))
    return {
        "in_proj_weight": jax.random.uniform(ks[0], (3 * embed_dim, embed_dim),
                                             jnp.float32, -scale, scale),
        "in_proj_bias": jax.random.uniform(ks[1], (3 * embed_dim,),
                                           jnp.float32, -scale, scale),
        "out_proj_weight": jax.random.uniform(ks[2], (embed_dim, embed_dim),
                                              jnp.float32, -scale, scale),
        "out_proj_bias": jax.random.uniform(ks[3], (embed_dim,),
                                            jnp.float32, -scale, scale),
        "nl_weight": jax.random.uniform(ks[4], (1, embed_dim),
                                        jnp.float32, -scale, scale),
    }


if __name__ == "__main__":
    L, S, N, E = 8, 8, 1, EMBED_DIM
    root = jax.random.PRNGKey(0)
    k_q, k_k, k_v, k_p, k_b = jax.random.split(root, 5)
    params = init_params(k_p, E)

    # 1) Single problem — exactly the PyTorch module's forward signature.
    query = jax.random.normal(k_q, (L, N, E), jnp.float32)
    key = jax.random.normal(k_k, (S, N, E), jnp.float32)
    value = jax.random.normal(k_v, (S, N, E), jnp.float32)
    fwd = jax.jit(ret_attn_forward)
    out = jax.block_until_ready(fwd(query, key, value, params))
    ref = ret_attn_reference_single(query[:, 0, :], key[:, 0, :],
                                    value[:, 0, :], params)
    assert out.shape == (L,)
    # approx=True EUP reciprocal carries ~2^-12 relative error -> 1e-3 tol.
    assert jnp.allclose(out, ref, atol=1e-3, rtol=1e-3), (out, ref)

    # 2) Many independent problems batched into one pallas_call
    #    (40 problems -> grid of 3 parallel steps of 16, last block padded).
    B = 40
    kb_q, kb_k, kb_v = jax.random.split(k_b, 3)
    qb = jax.random.normal(kb_q, (B, L, E), jnp.float32)
    kb = jax.random.normal(kb_k, (B, S, E), jnp.float32)
    vb = jax.random.normal(kb_v, (B, S, E), jnp.float32)
    fwd_b = jax.jit(ret_attn_forward_batched)
    out_b = jax.block_until_ready(fwd_b(qb, kb, vb, params))
    ref_b = jax.vmap(
        lambda q_, k_, v_: ret_attn_reference_single(q_, k_, v_, params)
    )(qb, kb, vb)
    assert out_b.shape == (B, L)
    assert jnp.allclose(out_b, ref_b, atol=1e-3, rtol=1e-3), (out_b, ref_b)

    print("KERNEL_OK")
</pallas_src>

<mosaic_0001>
module attributes {stable_mosaic.version = 11 : i64} {
  func.func @ret_attn_kernel(%arg0: i32, %arg1: memref<384x96xf32, #tpu.memory_space<vmem>>, %arg2: memref<96x32xf32, #tpu.memory_space<vmem>>, %arg3: memref<8x128xf32, #tpu.memory_space<vmem>>, %arg4: memref<128x128xf32, #tpu.memory_space<vmem>>, %arg5: memref<1x128xf32, #tpu.memory_space<vmem>>) attributes {dimension_semantics = [#tpu.dimension_semantics<parallel>], iteration_bounds = array<i64: 1>, scalar_prefetch = 0 : i64, scratch_operands = 0 : i64, tpu.core_type = #tpu.core_type<tc>, window_params = [{transform_indices = @transform_0, window_bounds = array<i64: 384, 96>}, {pipeline_mode = #tpu.pipeline_mode<synchronous>, transform_indices = @transform_1, window_bounds = array<i64: 96, 32>}, {pipeline_mode = #tpu.pipeline_mode<synchronous>, transform_indices = @transform_2, window_bounds = array<i64: 8, 128>}, {pipeline_mode = #tpu.pipeline_mode<synchronous>, transform_indices = @transform_3, window_bounds = array<i64: 128, 128>}, {transform_indices = @transform_4, window_bounds = array<i64: 1, 128>}]} {
    %c0 = arith.constant 0 : index
    %c0_0 = arith.constant 0 : index
    %0 = vector.load %arg1[%c0, %c0_0] : memref<384x96xf32, #tpu.memory_space<vmem>>, vector<384x96xf32>
    %c0_1 = arith.constant 0 : index
    %c0_2 = arith.constant 0 : index
    %1 = vector.load %arg2[%c0_1, %c0_2] : memref<96x32xf32, #tpu.memory_space<vmem>>, vector<96x32xf32>
    %cst = arith.constant dense<0.000000e+00> : vector<384x32xf32>
    %2 = tpu.matmul %0, %1, %cst {dimension_numbers = #tpu.dot_dimension_numbers<[1], [0], [0], [1], [0, 0, 1, 1], [], []>} : vector<384x96xf32>, vector<96x32xf32>, vector<384x32xf32> -> vector<384x32xf32>
    %3 = vector.extract_strided_slice %2 {offsets = [0, 0], sizes = [128, 32], strides = [1, 1]} : vector<384x32xf32> to vector<128x32xf32>
    %c0_3 = arith.constant 0 : index
    %c0_4 = arith.constant 0 : index
    %4 = vector.load %arg3[%c0_3, %c0_4] : memref<8x128xf32, #tpu.memory_space<vmem>>, vector<1x32xf32>
    %5 = vector.broadcast %4 : vector<1x32xf32> to vector<128x32xf32>
    %6 = arith.addf %3, %5 : vector<128x32xf32>
    %7 = vector.extract_strided_slice %2 {offsets = [128, 0], sizes = [128, 32], strides = [1, 1]} : vector<384x32xf32> to vector<128x32xf32>
    %8 = vector.extract_strided_slice %2 {offsets = [256, 0], sizes = [128, 32], strides = [1, 1]} : vector<384x32xf32> to vector<128x32xf32>
    %c0_5 = arith.constant 0 : index
    %c0_6 = arith.constant 0 : index
    %9 = vector.load %arg4[%c0_5, %c0_6] : memref<128x128xf32, #tpu.memory_space<vmem>>, vector<128x128xf32>
    %c2 = arith.constant 2 : index
    %c0_7 = arith.constant 0 : index
    %10 = vector.load %arg3[%c2, %c0_7] : memref<8x128xf32, #tpu.memory_space<vmem>>, vector<1x128xf32>
    %11 = vector.extract_strided_slice %6 {offsets = [0, 0], sizes = [128, 16], strides = [1, 1]} : vector<128x32xf32> to vector<128x16xf32>
    %12 = vector.extract_strided_slice %7 {offsets = [0, 0], sizes = [128, 16], strides = [1, 1]} : vector<128x32xf32> to vector<128x16xf32>
    %cst_8 = arith.constant dense<0.000000e+00> : vector<128x128xf32>
    %13 = tpu.matmul %11, %12, %cst_8 {dimension_numbers = #tpu.dot_dimension_numbers<[1], [1], [0], [0], [0, 0, 1, 0], [], []>} : vector<128x16xf32>, vector<128x16xf32>, vector<128x128xf32> -> vector<128x128xf32>
    %14 = arith.addf %13, %9 : vector<128x128xf32>
    %cst_9 = arith.constant dense<0xFF800000> : vector<128xf32>
    %15 = vector.multi_reduction <maximumf>, %14, %cst_9 [1] : vector<128x128xf32> to vector<128xf32>
    %16 = vector.shape_cast %15 : vector<128xf32> to vector<128x1xf32>
    %17 = vector.broadcast %16 : vector<128x1xf32> to vector<128x128xf32>
    %18 = arith.subf %14, %17 : vector<128x128xf32>
    %19 = math.exp %18 : vector<128x128xf32>
    %cst_10 = arith.constant dense<0.000000e+00> : vector<128xf32>
    %20 = vector.multi_reduction <add>, %19, %cst_10 [1] : vector<128x128xf32> to vector<128xf32>
    %21 = vector.shape_cast %20 : vector<128xf32> to vector<128x1xf32>
    %22 = tpu.reciprocal %21 {approx = true} : vector<128x1xf32> -> vector<128x1xf32>
    %23 = vector.broadcast %22 : vector<128x1xf32> to vector<128x128xf32>
    %24 = arith.mulf %19, %23 : vector<128x128xf32>
    %c1 = arith.constant 1 : index
    %c0_11 = arith.constant 0 : index
    %25 = vector.load %arg3[%c1, %c0_11] : memref<8x128xf32, #tpu.memory_space<vmem>>, vector<1x16xf32>
    %26 = vector.extract_strided_slice %8 {offsets = [0, 0], sizes = [128, 16], strides = [1, 1]} : vector<128x32xf32> to vector<128x16xf32>
    %cst_12 = arith.constant dense<0.000000e+00> : vector<1x128xf32>
    %27 = tpu.matmul %25, %26, %cst_12 {dimension_numbers = #tpu.dot_dimension_numbers<[1], [1], [0], [0], [0, 0, 1, 0], [], []>} : vector<1x16xf32>, vector<128x16xf32>, vector<1x128xf32> -> vector<1x128xf32>
    %cst_13 = arith.constant dense<0.000000e+00> : vector<1x128xf32>
    %28 = tpu.matmul %27, %24, %cst_13 {dimension_numbers = #tpu.dot_dimension_numbers<[1], [1], [0], [0], [0, 0, 1, 0], [], []>} : vector<1x128xf32>, vector<128x128xf32>, vector<1x128xf32> -> vector<1x128xf32>
    %29 = arith.addf %10, %28 : vector<1x128xf32>
    %30 = vector.extract_strided_slice %6 {offsets = [0, 16], sizes = [128, 16], strides = [1, 1]} : vector<128x32xf32> to vector<128x16xf32>
    %31 = vector.extract_strided_slice %7 {offsets = [0, 16], sizes = [128, 16], strides = [1, 1]} : vector<128x32xf32> to vector<128x16xf32>
    %cst_14 = arith.constant dense<0.000000e+00> : vector<128x128xf32>
    %32 = tpu.matmul %30, %31, %cst_14 {dimension_numbers = #tpu.dot_dimension_numbers<[1], [1], [0], [0], [0, 0, 1, 0], [], []>} : vector<128x16xf32>, vector<128x16xf32>, vector<128x128xf32> -> vector<128x128xf32>
    %33 = arith.addf %32, %9 : vector<128x128xf32>
    %cst_15 = arith.constant dense<0xFF800000> : vector<128xf32>
    %34 = vector.multi_reduction <maximumf>, %33, %cst_15 [1] : vector<128x128xf32> to vector<128xf32>
    %35 = vector.shape_cast %34 : vector<128xf32> to vector<128x1xf32>
    %36 = vector.broadcast %35 : vector<128x1xf32> to vector<128x128xf32>
    %37 = arith.subf %33, %36 : vector<128x128xf32>
    %38 = math.exp %37 : vector<128x128xf32>
    %cst_16 = arith.constant dense<0.000000e+00> : vector<128xf32>
    %39 = vector.multi_reduction <add>, %38, %cst_16 [1] : vector<128x128xf32> to vector<128xf32>
    %40 = vector.shape_cast %39 : vector<128xf32> to vector<128x1xf32>
    %41 = tpu.reciprocal %40 {approx = true} : vector<128x1xf32> -> vector<128x1xf32>
    %42 = vector.broadcast %41 : vector<128x1xf32> to vector<128x128xf32>
    %43 = arith.mulf %38, %42 : vector<128x128xf32>
    %c1_17 = arith.constant 1 : index
    %c16 = arith.constant 16 : index
    %44 = vector.load %arg3[%c1_17, %c16] : memref<8x128xf32, #tpu.memory_space<vmem>>, vector<1x16xf32>
    %45 = vector.extract_strided_slice %8 {offsets = [0, 16], sizes = [128, 16], strides = [1, 1]} : vector<128x32xf32> to vector<128x16xf32>
    %cst_18 = arith.constant dense<0.000000e+00> : vector<1x128xf32>
    %46 = tpu.matmul %44, %45, %cst_18 {dimension_numbers = #tpu.dot_dimension_numbers<[1], [1], [0], [0], [0, 0, 1, 0], [], []>} : vector<1x16xf32>, vector<128x16xf32>, vector<1x128xf32> -> vector<1x128xf32>
    %cst_19 = arith.constant dense<0.000000e+00> : vector<1x128xf32>
    %47 = tpu.matmul %46, %43, %cst_19 {dimension_numbers = #tpu.dot_dimension_numbers<[1], [1], [0], [0], [0, 0, 1, 0], [], []>} : vector<1x128xf32>, vector<128x128xf32>, vector<1x128xf32> -> vector<1x128xf32>
    %48 = arith.addf %29, %47 : vector<1x128xf32>
    %c0_20 = arith.constant 0 : index
    %c0_21 = arith.constant 0 : index
    %49 = vector.load %arg5[%c0_20, %c0_21] : memref<1x128xf32, #tpu.memory_space<vmem>>, vector<1x128xf32>
    tpu.vector_store %arg5[%c0_20, %c0_21], %48 {strides = array<i32>} : memref<1x128xf32, #tpu.memory_space<vmem>>, vector<1x128xf32>,
    return
  }
  func.func @transform_0(%arg0: i32) -> (i32, i32) {
    %c0_i32 = arith.constant 0 : i32
    %c0_i32_0 = arith.constant 0 : i32
    return %arg0, %c0_i32 : i32, i32
  }
  func.func @transform_1(%arg0: i32) -> (i32, i32) {
    %c0_i32 = arith.constant 0 : i32
    %c0_i32_0 = arith.constant 0 : i32
    %c0_i32_1 = arith.constant 0 : i32
    return %c0_i32, %c0_i32_0 : i32, i32
  }
  func.func @transform_2(%arg0: i32) -> (i32, i32) {
    %c0_i32 = arith.constant 0 : i32
    %c0_i32_0 = arith.constant 0 : i32
    %c0_i32_1 = arith.constant 0 : i32
    return %c0_i32, %c0_i32_0 : i32, i32
  }
  func.func @transform_3(%arg0: i32) -> (i32, i32) {
    %c0_i32 = arith.constant 0 : i32
    %c0_i32_0 = arith.constant 0 : i32
    %c0_i32_1 = arith.constant 0 : i32
    return %c0_i32, %c0_i32_0 : i32, i32
  }
  func.func @transform_4(%arg0: i32) -> (i32, i32) {
    %c0_i32 = arith.constant 0 : i32
    %c0_i32_0 = arith.constant 0 : i32
    return %c0_i32, %arg0 : i32, i32
  }
}

</mosaic_0001>

<bundles_post_ra>
// kernel: ret_attn_forward.1
= control target key start
LH: loop header
LB: loop body
LE: loop exit
PB: predicated region body
PF: predicated region fallthrough
CT: control target
= control target key end

     0   :  { %vm77_vm0 = vcmask 785408   ;;  %vm565_vm1 = vcmask 130048   ;;  %vm2922_vm3 = vmmov 0   ;;  %s3961_s1 = inlined_call_operand.vmem [shape: f32[96,32], index: 1, kind: input, shape index: {}]   ;;  %s3962_s0 = inlined_call_operand.vmem [shape: f32[384,96], index: 0, kind: input, shape index: {}]   ;;  %s3963_s2 = inlined_call_operand.vmem [shape: f32[8,128], index: 2, kind: input, shape index: {}]   ;;  %s3964_s3 = inlined_call_operand.vmem [shape: f32[128,128], index: 3, kind: input, shape index: {}]   ;;  %s3965_s4 = inlined_call_operand.vmem [shape: f32[1,128], index: 4, kind: output, shape index: {}]  }
   0x1   :  { %v65_v0 = vld [vmem:[%s3961_s1] sm:$0xff]  ;;  %v66_v1 = vld [vmem:[%s3961_s1 + $0x8] sm:$0xff]  ;;  %v67_v2 = vld [vmem:[%s3961_s1 + $0x10] sm:$0xff] }
   0x2   :  { %v2462_v3 = vpack.c.bf16 %v66_v1, %v65_v0  ;;  %v68_v4 = vld [vmem:[%s3961_s1 + $0x18] sm:$0xff]  ;;  %v69_v6 = vld [vmem:[%s3961_s1 + $0x20] sm:$0xff]  ;;  %v70_v7 = vld [vmem:[%s3961_s1 + $0x28] sm:$0xff] }
   0x3   :  { %v2466_v5 = vpack.c.bf16 %v68_v4, %v67_v2  ;;  %v17_v8 = vld [vmem:[%s3962_s0] sm:$0xff]  ;;  %v2470_v9 = vpack.c.bf16 %v70_v7, %v69_v6  ;;  %v71_v10 = vld [vmem:[%s3961_s1 + $0x30] sm:$0xff]  ;;  %v72_v11 = vld [vmem:[%s3961_s1 + $0x38] sm:$0xff]  ;;  %v2921_v2 = vmov 0.0|0.0  }
   0x4   :  { %2463 = vmatprep.subr.bf16.mxu0 %v2462_v3  ;;  %2694 = vmatprep.subr.bf16.mxu1 %v2462_v3  ;;  %v2474_v12 = vpack.c.bf16 %v72_v11, %v71_v10  ;;  %v73_v13 = vld [vmem:[%s3961_s1 + $0x40] sm:$0xff]  ;;  %v74_v14 = vld [vmem:[%s3961_s1 + $0x48] sm:$0xff]  ;;  %v75_v16 = vld [vmem:[%s3961_s1 + $0x50] sm:$0xff] }
   0x5   :  { %2465 = vmatpush3.bf16.msra.mxu0 %v2462_v3  ;;  %2700 = vmatpush3.bf16.msra.mxu1 %v2462_v3  ;;  %v2478_v15 = vpack.c.bf16 %v74_v14, %v73_v13  ;;  %v76_v17 = vld [vmem:[%s3961_s1 + $0x58] sm:$0xff]  ;;  %v49_v18 = vld [vmem:[%s3962_s0 + $0x100] sm:$0xff]  ;;  %v18_v20 = vld [vmem:[%s3962_s0 + $0x8] sm:$0xff] }
   0x6   :  { %2467 = vmatprep.subr.bf16.mxu0 %v2466_v5  ;;  %2138 = vmatprep.mubr.msk.f32.mxu0 %vm77_vm0, %v17_v8  ;;  %v2482_v19 = vpack.c.bf16 %v76_v17, %v75_v16  ;;  %v50_v21 = vld [vmem:[%s3962_s0 + $0x108] sm:$0xff]  ;;  %v19_v22 = vld [vmem:[%s3962_s0 + $0x10] sm:$0xff]  ;;  %v20_v24 = vld [vmem:[%s3962_s0 + $0x18] sm:$0xff] }
   0x7   :  { %2695 = vmatprep.subr.bf16.mxu1 %v2466_v5  ;;  %2186 = vmatprep.mubr.msk.f32.mxu1 %vm77_vm0, %v49_v18  ;;  %v51_v23 = vld [vmem:[%s3962_s0 + $0x110] sm:$0xff]  ;;  %v52_v25 = vld [vmem:[%s3962_s0 + $0x118] sm:$0xff]  ;;  %v21_v26 = vld [vmem:[%s3962_s0 + $0x20] sm:$0xff] }
   0x8   :  { %v53_v27 = vld [vmem:[%s3962_s0 + $0x120] sm:$0xff]  ;;  %v22_v28 = vld [vmem:[%s3962_s0 + $0x28] sm:$0xff]  ;;  %v23_v30 = vld [vmem:[%s3962_s0 + $0x30] sm:$0xff] }
   0x9   :  { %2469 = vmatpush3.bf16.msra.mxu0 %v2466_v5  ;;  %2701 = vmatpush3.bf16.msra.mxu1 %v2466_v5  ;;  %v54_v29 = vld [vmem:[%s3962_s0 + $0x128] sm:$0xff]  ;;  %v55_v31 = vld [vmem:[%s3962_s0 + $0x130] sm:$0xff]  ;;  %v24_v32 = vld [vmem:[%s3962_s0 + $0x38] sm:$0xff] }
   0xa   :  { %2471 = vmatprep.subr.bf16.mxu0 %v2470_v9  ;;  %2696 = vmatprep.subr.bf16.mxu1 %v2470_v9  ;;  %v56_v33 = vld [vmem:[%s3962_s0 + $0x138] sm:$0xff]  ;;  %v25_v34 = vld [vmem:[%s3962_s0 + $0x40] sm:$0xff]  ;;  %v26_v36 = vld [vmem:[%s3962_s0 + $0x48] sm:$0xff] }
   0xb   :  { %v57_v35 = vld [vmem:[%s3962_s0 + $0x140] sm:$0xff]  ;;  %v58_v37 = vld [vmem:[%s3962_s0 + $0x148] sm:$0xff]  ;;  %v27_v38 = vld [vmem:[%s3962_s0 + $0x50] sm:$0xff] }
   0xc   :  { %v59_v39 = vld [vmem:[%s3962_s0 + $0x150] sm:$0xff]  ;;  %v28_v40 = vld [vmem:[%s3962_s0 + $0x58] sm:$0xff]  ;;  %v29_v42 = vld [vmem:[%s3962_s0 + $0x60] sm:$0xff] }
   0xd   :  { %2473 = vmatpush3.bf16.msra.mxu0 %v2470_v9  ;;  %2702 = vmatpush3.bf16.msra.mxu1 %v2470_v9  ;;  %v60_v41 = vld [vmem:[%s3962_s0 + $0x158] sm:$0xff]  ;;  %v61_v43 = vld [vmem:[%s3962_s0 + $0x160] sm:$0xff]  ;;  %v30_v44 = vld [vmem:[%s3962_s0 + $0x68] sm:$0xff] }
   0xe   :  { %2475 = vmatprep.subr.bf16.mxu0 %v2474_v12  ;;  %2697 = vmatprep.subr.bf16.mxu1 %v2474_v12  ;;  %v62_v45 = vld [vmem:[%s3962_s0 + $0x168] sm:$0xff]  ;;  %v31_v46 = vld [vmem:[%s3962_s0 + $0x70] sm:$0xff]  ;;  %v32_v48 = vld [vmem:[%s3962_s0 + $0x78] sm:$0xff] }
   0xf   :  { %v63_v47 = vld [vmem:[%s3962_s0 + $0x170] sm:$0xff]  ;;  %v64_v49 = vld [vmem:[%s3962_s0 + $0x178] sm:$0xff]  ;;  %v33_v50 = vld [vmem:[%s3962_s0 + $0x80] sm:$0xff] }
  0x10   :  { %v34_v51 = vld [vmem:[%s3962_s0 + $0x88] sm:$0xff]  ;;  %v35_v52 = vld [vmem:[%s3962_s0 + $0x90] sm:$0xff]  ;;  %v36_v53 = vld [vmem:[%s3962_s0 + $0x98] sm:$0xff] }
  0x11   :  { %2477 = vmatpush3.bf16.msra.mxu0 %v2474_v12  ;;  %2703 = vmatpush3.bf16.msra.mxu1 %v2474_v12  ;;  %v37_v54 = vld [vmem:[%s3962_s0 + $0xa0] sm:$0xff]  ;;  %v38_v55 = vld [vmem:[%s3962_s0 + $0xa8] sm:$0xff]  ;;  %v39_v56 = vld [vmem:[%s3962_s0 + $0xb0] sm:$0xff] }
  0x12   :  { %2479 = vmatprep.subr.bf16.mxu0 %v2478_v15  ;;  %2698 = vmatprep.subr.bf16.mxu1 %v2478_v15  ;;  %v40_v57 = vld [vmem:[%s3962_s0 + $0xb8] sm:$0xff]  ;;  %v41_v58 = vld [vmem:[%s3962_s0 + $0xc0] sm:$0xff]  ;;  %v42_v59 = vld [vmem:[%s3962_s0 + $0xc8] sm:$0xff] }
  0x13   :  { %v43_v60 = vld [vmem:[%s3962_s0 + $0xd0] sm:$0xff]  ;;  %v44_v61 = vld [vmem:[%s3962_s0 + $0xd8] sm:$0xff]  ;;  %v45_v62 = vld [vmem:[%s3962_s0 + $0xe0] sm:$0xff] }
  0x14   :  { %v46_v63 = vld [vmem:[%s3962_s0 + $0xe8] sm:$0xff]  ;;  %v47_v0 = vld [vmem:[%s3962_s0 + $0xf0] sm:$0xff]  ;;  %v48_v1 = vld [vmem:[%s3962_s0 + $0xf8] sm:$0xff]  ;;  %s2924_s0 = smov 112  }
  0x15   :  { %2481 = vmatpush3.bf16.msra.mxu0 %v2478_v15  ;;  %2704 = vmatpush3.bf16.msra.mxu1 %v2478_v15  ;;  %v3182_v3 = vld [vmem:[%s3963_s2] ss:$0 sm:$0xff]  ;;  %vm3200_vm2 = vmpackc.low %vm565_vm1, %vm565_vm1 }
  0x16   :  { %2483 = vmatprep.subr.bf16.mxu0 %v2482_v19  ;;  %2699 = vmatprep.subr.bf16.mxu1 %v2482_v19 }
  0x19   :  { %2485 = vmatpush3.bf16.msra.mxu0 %v2482_v19  ;;  %2705 = vmatpush3.bf16.msra.mxu1 %v2482_v19 }
  0x1a   :  { %2534 = vmatprep.subr.bf16.mxu0 %v2921_v2 }
  0x1c   :  { %2139 = vmatmul.mubr.msk.f32.vlgmr.msra.gmra.mrb[0].mxu0 %vm77_vm0, %v18_v20  ;;  %2187 = vmatmul.mubr.msk.f32.vlgmr.msra.gmra.mrb[0].mxu1 %vm77_vm0, %v50_v21 }
  0x1d   :  { %2141 = vmatprep.mubr.msk.f32.mxu0 %vm77_vm0, %v19_v22  ;;  %2189 = vmatprep.mubr.msk.f32.mxu1 %vm77_vm0, %v51_v23 }
  0x20   :  { %2142 = vmatmul.mubr.msk.f32.gmra.mrb[2].mxu0 %vm77_vm0, %v20_v24  ;;  %2190 = vmatmul.mubr.msk.f32.gmra.mrb[2].mxu1 %vm77_vm0, %v52_v25 }
  0x21   :  { %2144 = vmatprep.mubr.msk.f32.mxu0 %vm77_vm0, %v21_v26  ;;  %2192 = vmatprep.mubr.msk.f32.mxu1 %vm77_vm0, %v53_v27 }
  0x24   :  { %2145 = vmatmul.mubr.msk.f32.gmra.mrb[4].mxu0 %vm77_vm0, %v22_v28  ;;  %2193 = vmatmul.mubr.msk.f32.gmra.mrb[4].mxu1 %vm77_vm0, %v54_v29 }
  0x25   :  { %2147 = vmatprep.mubr.msk.f32.mxu0 %vm77_vm0, %v23_v30  ;;  %2195 = vmatprep.mubr.msk.f32.mxu1 %vm77_vm0, %v55_v31 }
  0x28   :  { %2148 = vmatmul.mubr.msk.f32.gmra.mrb[6].mxu0 %vm77_vm0, %v24_v32  ;;  %2196 = vmatmul.mubr.msk.f32.gmra.mrb[6].mxu1 %vm77_vm0, %v56_v33 }
  0x29   :  { %2150 = vmatprep.mubr.msk.f32.mxu0 %vm77_vm0, %v25_v34  ;;  %2198 = vmatprep.mubr.msk.f32.mxu1 %vm77_vm0, %v57_v35 }
  0x2c   :  { %2151 = vmatmul.mubr.msk.f32.gmra.mrb[8].mxu0 %vm77_vm0, %v26_v36  ;;  %2199 = vmatmul.mubr.msk.f32.gmra.mrb[8].mxu1 %vm77_vm0, %v58_v37 }
  0x2d   :  { %2153 = vmatprep.mubr.msk.f32.mxu0 %vm77_vm0, %v27_v38  ;;  %2201 = vmatprep.mubr.msk.f32.mxu1 %vm77_vm0, %v59_v39 }
  0x30   :  { %2154 = vmatmul.mubr.msk.f32.gmra.mrb[10].mxu0 %vm77_vm0, %v28_v40  ;;  %2202 = vmatmul.mubr.msk.f32.gmra.mrb[10].mxu1 %vm77_vm0, %v60_v41 }
  0x31   :  { %2156 = vmatprep.mubr.msk.f32.mxu0 %vm77_vm0, %v29_v42  ;;  %2204 = vmatprep.mubr.msk.f32.mxu1 %vm77_vm0, %v61_v43 }
  0x34   :  { %2157 = vmatmul.mubr.msk.f32.gmra.mrb[12].mxu0 %vm77_vm0, %v30_v44  ;;  %2205 = vmatmul.mubr.msk.f32.gmra.mrb[12].mxu1 %vm77_vm0, %v62_v45 }
  0x35   :  { %2159 = vmatprep.mubr.msk.f32.mxu0 %vm77_vm0, %v31_v46  ;;  %2207 = vmatprep.mubr.msk.f32.mxu1 %vm77_vm0, %v63_v47 }
  0x38   :  { %2160 = vmatmul.mubr.msk.f32.gmra.mrb[14].mxu0 %vm77_vm0, %v32_v48  ;;  %2208 = vmatmul.mubr.msk.f32.gmra.mrb[14].mxu1 %vm77_vm0, %v64_v49 }
  0x39   :  { %2162 = vmatprep.mubr.msk.f32.mxu0 %vm77_vm0, %v33_v50 }
  0x3c   :  { %2163 = vmatmul.mubr.msk.f32.gmra.mrb[16].mxu0 %vm77_vm0, %v34_v51 }
  0x3d   :  { %2165 = vmatprep.mubr.msk.f32.mxu0 %vm77_vm0, %v35_v52 }
  0x40   :  { %2166 = vmatmul.mubr.msk.f32.gmra.mrb[18].mxu0 %vm77_vm0, %v36_v53 }
  0x41   :  { %2168 = vmatprep.mubr.msk.f32.mxu0 %vm77_vm0, %v37_v54 }
  0x44   :  { %2169 = vmatmul.mubr.msk.f32.gmra.mrb[20].mxu0 %vm77_vm0, %v38_v55 }
  0x45   :  { %2171 = vmatprep.mubr.msk.f32.mxu0 %vm77_vm0, %v39_v56 }
  0x48   :  { %2172 = vmatmul.mubr.msk.f32.gmra.mrb[22].mxu0 %vm77_vm0, %v40_v57 }
  0x49   :  { %2174 = vmatprep.mubr.msk.f32.mxu0 %vm77_vm0, %v41_v58 }
  0x4c   :  { %2175 = vmatmul.mubr.msk.f32.gmra.mrb[24].mxu0 %vm77_vm0, %v42_v59 }
  0x4d   :  { %2177 = vmatprep.mubr.msk.f32.mxu0 %vm77_vm0, %v43_v60 }
  0x50   :  { %2178 = vmatmul.mubr.msk.f32.gmra.mrb[26].mxu0 %vm77_vm0, %v44_v61  ;;  %v2923_v61 = vmov 0.0  }
  0x51   :  { %2180 = vmatprep.mubr.msk.f32.mxu0 %vm77_vm0, %v45_v62 }
  0x54   :  { %2181 = vmatmul.mubr.msk.f32.gmra.mrb[28].mxu0 %vm77_vm0, %v46_v63 }
  0x55   :  { %2183 = vmatprep.mubr.msk.f32.mxu0 %vm77_vm0, %v47_v0 }
  0x58   :  { %2184 = vmatmul.mubr.msk.f32.gmra.mrb[30].mxu0 %vm77_vm0, %v48_v1 }
  0x59   :  { %2298 = vmatprep.mubr.msk.f32.mxu0 %vm2922_vm3, %v2923_v61 }
  0xef   :  { %v2140_v4 = vpop.f32.mrb[0].mxu0  ;;  %v3184_v5 = vpop.f32.mrb[0].mxu1 }
  0xf0   :  { %v3187_v6 = vadd.f32 %v2140_v4, %v3182_v3  ;;  %v288_v7 = vpop.f32.mrb[1].mxu0  ;;  %v3189_v8 = vpop.f32.mrb[1].mxu1 }
  0xf1   :  { %v3192_v9 = vadd.f32 %v3182_v3, %v288_v7  ;;  %v2753_v10 = vpack.i.bf16 %v3184_v5, %v3189_v8  ;;  %v2535_v11 = vpack.c.bf16 %v3184_v5, %v3189_v8 }
  0xf3   :  { %v2143_v13 = vpop.f32.mrb[2].mxu0  ;;  %2242 = vmatprep.mubr.msk.f32.mxu1 %vm565_vm1, %v3192_v9  ;;  %2537 = vmatpush3.bf16.xpose.msk.msra.mxu0 %vm3200_vm2, %v2535_v11  ;;  %v3208_v14 = vpop.f32.mrb[2].mxu1 }
  0xf4   :  { %v3211_v15 = vadd.f32 %v2143_v13, %v3182_v3  ;;  %v298_v16 = vpop.f32.mrb[3].mxu0  ;;  %v3213_v17 = vpop.f32.mrb[3].mxu1  ;;  %2538 = vmatprep.subr.bf16.mxu0 %v2921_v2 }
  0xf5   :  { %v3217_v18 = vadd.f32 %v3182_v3, %v298_v16  ;;  %v2758_v19 = vpack.i.bf16 %v3208_v14, %v3213_v17  ;;  %v2539_v20 = vpack.c.bf16 %v3208_v14, %v3213_v17 }
  0xf7   :  { %v2146_v21 = vpop.f32.mrb[4].mxu0  ;;  %v3223_v22 = vpop.f32.mrb[4].mxu1 }
  0xf8   :  { %v3226_v23 = vadd.f32 %v2146_v21, %v3182_v3  ;;  %v308_v24 = vpop.f32.mrb[5].mxu0  ;;  %v3228_v25 = vpop.f32.mrb[5].mxu1 }
  0xf9   :  { %v3231_v26 = vadd.f32 %v3182_v3, %v308_v24  ;;  %v2763_v27 = vpack.i.bf16 %v3223_v22, %v3228_v25  ;;  %v2543_v28 = vpack.c.bf16 %v3223_v22, %v3228_v25 }
  0xfb   :  { %v2149_v29 = vpop.f32.mrb[6].mxu0  ;;  %2541 = vmatpush3.bf16.xpose.msk.msra.mxu0 %vm3200_vm2, %v2539_v20  ;;  %v3239_v30 = vpop.f32.mrb[6].mxu1 }
  0xfc   :  { %v3242_v31 = vadd.f32 %v2149_v29, %v3182_v3  ;;  %v318_v32 = vpop.f32.mrb[7].mxu0  ;;  %2542 = vmatprep.subr.bf16.mxu0 %v2921_v2  ;;  %v3245_v33 = vpop.f32.mrb[7].mxu1 }
  0xfd   :  { %v3248_v34 = vadd.f32 %v3182_v3, %v318_v32  ;;  %v2768_v35 = vpack.i.bf16 %v3239_v30, %v3245_v33  ;;  %v2547_v36 = vpack.c.bf16 %v3239_v30, %v3245_v33 }
  0xff   :  { %v2152_v37 = vpop.f32.mrb[8].mxu0  ;;  %v3254_v38 = vpop.f32.mrb[8].mxu1 }
 0x100   :  { %v3257_v39 = vadd.f32 %v2152_v37, %v3182_v3  ;;  %v328_v40 = vpop.f32.mrb[9].mxu0  ;;  %v3259_v41 = vpop.f32.mrb[9].mxu1 }
 0x101   :  { %v3262_v42 = vadd.f32 %v3182_v3, %v328_v40  ;;  %v2773_v43 = vpack.i.bf16 %v3254_v38, %v3259_v41  ;;  %v2551_v44 = vpack.c.bf16 %v3254_v38, %v3259_v41 }
 0x103   :  { %v2155_v45 = vpop.f32.mrb[10].mxu0  ;;  %2545 = vmatpush3.bf16.xpose.msk.msra.mxu0 %vm3200_vm2, %v2543_v28  ;;  %v3270_v46 = vpop.f32.mrb[10].mxu1 }
 0x104   :  { %v3273_v47 = vadd.f32 %v2155_v45, %v3182_v3  ;;  %v338_v48 = vpop.f32.mrb[11].mxu0  ;;  %2546 = vmatprep.subr.bf16.mxu0 %v2921_v2  ;;  %v3276_v49 = vpop.f32.mrb[11].mxu1 }
 0x105   :  { %v3279_v50 = vadd.f32 %v3182_v3, %v338_v48  ;;  %v2778_v51 = vpack.i.bf16 %v3270_v46, %v3276_v49  ;;  %v2555_v52 = vpack.c.bf16 %v3270_v46, %v3276_v49 }
 0x107   :  { %v2158_v53 = vpop.f32.mrb[12].mxu0  ;;  %v3285_v54 = vpop.f32.mrb[12].mxu1 }
 0x108   :  { %v3288_v55 = vadd.f32 %v2158_v53, %v3182_v3  ;;  %v348_v56 = vpop.f32.mrb[13].mxu0  ;;  %v3290_v57 = vpop.f32.mrb[13].mxu1 }
 0x109   :  { %v3293_v58 = vadd.f32 %v3182_v3, %v348_v56  ;;  %v2783_v59 = vpack.i.bf16 %v3285_v54, %v3290_v57  ;;  %v2559_v60 = vpack.c.bf16 %v3285_v54, %v3290_v57 }
 0x10b   :  { %v2161_v62 = vpop.f32.mrb[14].mxu0  ;;  %2549 = vmatpush3.bf16.xpose.msk.msra.mxu0 %vm3200_vm2, %v2547_v36  ;;  %v3303_v63 = vpop.f32.mrb[14].mxu1 }
 0x10c   :  { %v3306_v0 = vadd.f32 %v2161_v62, %v3182_v3  ;;  %v358_v1 = vpop.f32.mrb[15].mxu0  ;;  %2550 = vmatprep.subr.bf16.mxu0 %v2921_v2  ;;  %v3309_v4 = vpop.f32.mrb[15].mxu1 }
 0x10d   :  { %v3312_v7 = vadd.f32 %v3182_v3, %v358_v1  ;;  %v2788_v11 = vpack.i.bf16 %v3303_v63, %v3309_v4  ;;  %v2563_v13 = vpack.c.bf16 %v3303_v63, %v3309_v4  ;;  %v3638_v4 = vld [vmem:[%s3964_s3 + $0x50] sm:$0xff] }
 0x10f   :  { %v2164_v16 = vpop.f32.mrb[16].mxu0 }
 0x110   :  { %v368_v20 = vpop.f32.mrb[17].mxu0 }
 0x111   :  { %v2486_v21 = vpack.c.bf16 %v2164_v16, %v368_v20  ;;  %v2713_v24 = vpack.i.bf16 %v2164_v16, %v368_v20 }
 0x113   :  { %2714 = vrot.lane.b32.xlu0 %v2713_v24, %s2924_s0  ;;  %2488 = vmatprep.subr.msk.bf16.mxu1 %vm3200_vm2, %v2486_v21  ;;  %v2167_v28 = vpop.f32.mrb[18].mxu0 }
 0x114   :  { %2491 = vmatpush3.bf16.xpose.msk.msra.mxu1 %vm3200_vm2, %v2486_v21  ;;  %v378_v3 = vpop.f32.mrb[19].mxu0  ;;  %2553 = vmatpush3.bf16.xpose.msk.msra.mxu0 %vm3200_vm2, %v2551_v44 }
 0x115   :  { %v2718_v29 = vpack.i.bf16 %v2167_v28, %v378_v3  ;;  %v2492_v32 = vpack.c.bf16 %v2167_v28, %v378_v3  ;;  %2554 = vmatprep.subr.bf16.mxu0 %v2921_v2 }
 0x117   :  { %2719 = vrot.lane.b32.xlu0 %v2718_v29, %s2924_s0  ;;  %2494 = vmatprep.subr.msk.bf16.mxu1 %vm3200_vm2, %v2492_v32  ;;  %v2170_v36 = vpop.f32.mrb[20].mxu0 }
 0x118   :  { %v388_v37 = vpop.f32.mrb[21].mxu0 }
 0x119   :  { %v2498_v40 = vpack.c.bf16 %v2170_v36, %v388_v37  ;;  %v2723_v45 = vpack.i.bf16 %v2170_v36, %v388_v37 }
 0x11b   :  { %v2173_v48 = vpop.f32.mrb[22].mxu0  ;;  %2724 = vrot.lane.b32.xlu1 %v2723_v45, %s2924_s0 }
 0x11c   :  { %2497 = vmatpush3.bf16.xpose.msk.msra.mxu1 %vm3200_vm2, %v2492_v32  ;;  %v398_v44 = vpop.f32.mrb[23].mxu0  ;;  %2557 = vmatpush3.bf16.xpose.msk.msra.mxu0 %vm3200_vm2, %v2555_v52 }
 0x11d   :  { %v2728_v53 = vpack.i.bf16 %v2173_v48, %v398_v44  ;;  %v2504_v56 = vpack.c.bf16 %v2173_v48, %v398_v44  ;;  %2500 = vmatprep.subr.msk.bf16.mxu1 %vm3200_vm2, %v2498_v40  ;;  %2558 = vmatprep.subr.bf16.mxu0 %v2921_v2  ;;  %v3360_v48 = vld [vmem:[%s3963_s2 + $0x1] sm:$0x1] }
 0x11f   :  { %v2176_v62 = vpop.f32.mrb[24].mxu0  ;;  %2729 = vrot.lane.b32.xlu1 %v2728_v53, %s2924_s0 }
 0x120   :  { %v408_v1 = vpop.f32.mrb[25].mxu0 }
 0x121   :  { %v2733_v16 = vpack.i.bf16 %v2176_v62, %v408_v1  ;;  %v2510_v20 = vpack.c.bf16 %v2176_v62, %v408_v1 }
 0x123   :  { %v2179_v21 = vpop.f32.mrb[26].mxu0  ;;  %2734 = vrot.lane.b32.xlu0 %v2733_v16, %s2924_s0 }
 0x124   :  { %2503 = vmatpush3.bf16.xpose.msk.msra.mxu1 %vm3200_vm2, %v2498_v40  ;;  %v418_v52 = vpop.f32.mrb[27].mxu0  ;;  %2561 = vmatpush3.bf16.xpose.msk.msra.mxu0 %vm3200_vm2, %v2559_v60 }
 0x125   :  { %v2738_v24 = vpack.i.bf16 %v2179_v21, %v418_v52  ;;  %v2516_v28 = vpack.c.bf16 %v2179_v21, %v418_v52  ;;  %2506 = vmatprep.subr.msk.bf16.mxu1 %vm3200_vm2, %v2504_v56  ;;  %2562 = vmatprep.subr.bf16.mxu0 %v2921_v2 }
 0x127   :  { %v2182_v3 = vpop.f32.mrb[28].mxu0  ;;  %2739 = vrot.lane.b32.xlu1 %v2738_v24, %s2924_s0 }
 0x128   :  { %v428_v29 = vpop.f32.mrb[29].mxu0 }
 0x129   :  { %v2743_v32 = vpack.i.bf16 %v2182_v3, %v428_v29  ;;  %v2522_v36 = vpack.c.bf16 %v2182_v3, %v428_v29 }
 0x12b   :  { %2744 = vrot.lane.b32.xlu0 %v2743_v32, %s2924_s0  ;;  %v2185_v37 = vpop.f32.mrb[30].mxu0 }
 0x12c   :  { %v438_v40 = vpop.f32.mrb[31].mxu0  ;;  %2509 = vmatpush3.bf16.xpose.msk.msra.mxu1 %vm3200_vm2, %v2504_v56  ;;  %2565 = vmatpush3.bf16.xpose.msk.msra.mxu0 %vm3200_vm2, %v2563_v13 }
 0x12d   :  { %v2748_v60 = vpack.i.bf16 %v2185_v37, %v438_v40  ;;  %v2528_v45 = vpack.c.bf16 %v2185_v37, %v438_v40  ;;  %2512 = vmatprep.subr.msk.bf16.mxu1 %vm3200_vm2, %v2510_v20 }
 0x12f   :  { %1144 = vrot.lane.b32.xlu0 %v3192_v9, %s2924_s0  ;;  %2749 = vrot.lane.b32.xlu1 %v2748_v60, %s2924_s0 }
 0x133   :  { %1148 = vrot.lane.b32.xlu0 %v3217_v18, %s2924_s0  ;;  %1146 = vrot.lane.b32.xlu1 %v3187_v6, %s2924_s0 }
 0x134   :  { %2515 = vmatpush3.bf16.xpose.msk.msra.mxu1 %vm3200_vm2, %v2510_v20  ;;  %2299 = vmatmul.mubr.msk.f32.vlgmr.msra.gmra.mrb[32].mxu0 %vm565_vm1, %v3360_v48 }
 0x135   :  { %2518 = vmatprep.subr.msk.bf16.mxu1 %vm3200_vm2, %v2516_v28 }
 0x137   :  { %1152 = vrot.lane.b32.xlu0 %v3231_v26, %s2924_s0  ;;  %1150 = vrot.lane.b32.xlu1 %v3211_v15, %s2924_s0 }
 0x13b   :  { %1156 = vrot.lane.b32.xlu0 %v3248_v34, %s2924_s0  ;;  %1154 = vrot.lane.b32.xlu1 %v3226_v23, %s2924_s0 }
 0x13c   :  { %2521 = vmatpush3.bf16.xpose.msk.msra.mxu1 %vm3200_vm2, %v2516_v28 }
 0x13d   :  { %2524 = vmatprep.subr.msk.bf16.mxu1 %vm3200_vm2, %v2522_v36 }
 0x13f   :  { %1160 = vrot.lane.b32.xlu0 %v3262_v42, %s2924_s0  ;;  %1158 = vrot.lane.b32.xlu1 %v3242_v31, %s2924_s0 }
 0x143   :  { %1164 = vrot.lane.b32.xlu0 %v3279_v50, %s2924_s0  ;;  %1162 = vrot.lane.b32.xlu1 %v3257_v39, %s2924_s0 }
 0x144   :  { %2527 = vmatpush3.bf16.xpose.msk.msra.mxu1 %vm3200_vm2, %v2522_v36 }
 0x145   :  { %2530 = vmatprep.subr.msk.bf16.mxu1 %vm3200_vm2, %v2528_v45 }
 0x147   :  { %1168 = vrot.lane.b32.xlu0 %v3293_v58, %s2924_s0  ;;  %1166 = vrot.lane.b32.xlu1 %v3273_v47, %s2924_s0 }
 0x14b   :  { %1172 = vrot.lane.b32.xlu0 %v3312_v7, %s2924_s0  ;;  %1170 = vrot.lane.b32.xlu1 %v3288_v55, %s2924_s0 }
 0x14c   :  { %2533 = vmatpush3.bf16.xpose.msk.msra.mxu1 %vm3200_vm2, %v2528_v45 }
 0x14d   :  { %2566 = vmatprep.subr.bf16.mxu1 %v2921_v2 }
 0x14f   :  { %1174 = vrot.lane.b32.xlu1 %v3306_v0, %s2924_s0  ;;  %2754 = vrot.lane.b32.xlu0 %v2753_v10, %s2924_s0 }
 0x153   :  { %2243 = vmatmul.mubr.msk.f32.vlgmr.msra.gmra.mrb[16].mxu1 %vm565_vm1, %v3187_v6  ;;  %2759 = vrot.lane.b32.xlu1 %v2758_v19, %s2924_s0 }
 0x154   :  { %2245 = vmatprep.mubr.msk.f32.mxu1 %vm565_vm1, %v3217_v18  ;;  %2764 = vrot.lane.b32.xlu0 %v2763_v27, %s2924_s0 }
 0x157   :  { %2246 = vmatmul.mubr.msk.f32.gmra.mrb[18].mxu1 %vm565_vm1, %v3211_v15  ;;  %2769 = vrot.lane.b32.xlu1 %v2768_v35, %s2924_s0 }
 0x158   :  { %2248 = vmatprep.mubr.msk.f32.mxu1 %vm565_vm1, %v3231_v26  ;;  %2774 = vrot.lane.b32.xlu0 %v2773_v43, %s2924_s0 }
 0x15b   :  { %2249 = vmatmul.mubr.msk.f32.gmra.mrb[20].mxu1 %vm565_vm1, %v3226_v23  ;;  %2784 = vrot.lane.b32.xlu1 %v2783_v59, %s2924_s0 }
 0x15c   :  { %2251 = vmatprep.mubr.msk.f32.mxu1 %vm565_vm1, %v3248_v34  ;;  %2779 = vrot.lane.b32.xlu0 %v2778_v51, %s2924_s0 }
 0x15f   :  { %2252 = vmatmul.mubr.msk.f32.gmra.mrb[22].mxu1 %vm565_vm1, %v3242_v31 }
 0x160   :  { %2254 = vmatprep.mubr.msk.f32.mxu1 %vm565_vm1, %v3262_v42 }
 0x163   :  { %2255 = vmatmul.mubr.msk.f32.gmra.mrb[24].mxu1 %vm565_vm1, %v3257_v39 }
 0x164   :  { %2257 = vmatprep.mubr.msk.f32.mxu1 %vm565_vm1, %v3279_v50 }
 0x167   :  { %2258 = vmatmul.mubr.msk.f32.gmra.mrb[26].mxu1 %vm565_vm1, %v3273_v47 }
 0x168   :  { %2260 = vmatprep.mubr.msk.f32.mxu1 %vm565_vm1, %v3293_v58 }
 0x16b   :  { %2261 = vmatmul.mubr.msk.f32.gmra.mrb[28].mxu1 %vm565_vm1, %v3288_v55 }
 0x16c   :  { %2263 = vmatprep.mubr.msk.f32.mxu1 %vm565_vm1, %v3312_v7 }
 0x16f   :  { %2264 = vmatmul.mubr.msk.f32.gmra.mrb[30].mxu1 %vm565_vm1, %v3306_v0 }
 0x170   :  { %2333 = vmatprep.mubr.msk.f32.mxu1 %vm2922_vm3, %v2923_v61 }
 0x185   :  { %v2715_v5 = vpop.permute.xlu0 %2714 }
 0x186   :  { %v2717_v6 = vunpack.i.h.bf16 %v2715_v5  ;;  %v2716_v8 = vunpack.i.l.bf16 %v2715_v5 }
 0x188   :  { %v2590_v9 = vpack.c.bf16 %v2717_v6, %v2716_v8 }
 0x189   :  { %v2720_v10 = vpop.permute.xlu0 %2719 }
 0x18a   :  { %2592 = vmatprep.subr.msk.bf16.mxu0 %vm3200_vm2, %v2590_v9  ;;  %v2722_v14 = vunpack.i.h.bf16 %v2720_v10  ;;  %v2721_v15 = vunpack.i.l.bf16 %v2720_v10 }
 0x18b   :  { %2595 = vmatpush3.bf16.xpose.msk.msra.mxu0 %vm3200_vm2, %v2590_v9 }
 0x18c   :  { %v2596_v17 = vpack.c.bf16 %v2722_v14, %v2721_v15 }
 0x18d   :  { %v2725_v18 = vpop.permute.xlu1 %2724 }
 0x18e   :  { %2598 = vmatprep.subr.msk.bf16.mxu0 %vm3200_vm2, %v2596_v17  ;;  %v2727_v19 = vunpack.i.h.bf16 %v2725_v18  ;;  %v2726_v22 = vunpack.i.l.bf16 %v2725_v18 }
 0x190   :  { %v2602_v23 = vpack.c.bf16 %v2727_v19, %v2726_v22 }
 0x191   :  { %v2730_v25 = vpop.permute.xlu1 %2729 }
 0x192   :  { %v2732_v26 = vunpack.i.h.bf16 %v2730_v25  ;;  %v2731_v27 = vunpack.i.l.bf16 %v2730_v25 }
 0x193   :  { %2601 = vmatpush3.bf16.xpose.msk.msra.mxu0 %vm3200_vm2, %v2596_v17 }
 0x194   :  { %2604 = vmatprep.subr.msk.bf16.mxu0 %vm3200_vm2, %v2602_v23  ;;  %v2608_v31 = vpack.c.bf16 %v2732_v26, %v2731_v27 }
 0x195   :  { %v2735_v30 = vpop.permute.xlu0 %2734 }
 0x196   :  { %v2737_v34 = vunpack.i.h.bf16 %v2735_v30  ;;  %v2736_v35 = vunpack.i.l.bf16 %v2735_v30 }
 0x198   :  { %v2614_v39 = vpack.c.bf16 %v2737_v34, %v2736_v35 }
 0x199   :  { %v2740_v33 = vpop.permute.xlu1 %2739 }
 0x19a   :  { %v2742_v43 = vunpack.i.h.bf16 %v2740_v33  ;;  %v2741_v46 = vunpack.i.l.bf16 %v2740_v33 }
 0x19b   :  { %2607 = vmatpush3.bf16.xpose.msk.msra.mxu0 %vm3200_vm2, %v2602_v23 }
 0x19c   :  { %2610 = vmatprep.subr.msk.bf16.mxu0 %vm3200_vm2, %v2608_v31  ;;  %v2620_v50 = vpack.c.bf16 %v2742_v43, %v2741_v46 }
 0x19d   :  { %v2745_v38 = vpop.permute.xlu0 %2744 }
 0x19e   :  { %v2747_v55 = vunpack.i.h.bf16 %v2745_v38  ;;  %v2746_v57 = vunpack.i.l.bf16 %v2745_v38 }
 0x1a0   :  { %v2626_v0 = vpack.c.bf16 %v2747_v55, %v2746_v57  ;;  %v3572_v55 = vld [vmem:[%s3964_s3 + $0x10] sm:$0xff]  ;;  %v3577_v57 = vld [vmem:[%s3964_s3 + $0x20] sm:$0xff] }
 0x1a1   :  { %v1145_v41 = vpop.permute.xlu0 %1144  ;;  %v2750_v42 = vpop.permute.xlu1 %2749 }
 0x1a2   :  { %2368 = vmatprep.mubr.msk.f32.mxu0 %vm565_vm1, %v1145_v41  ;;  %v2752_v44 = vunpack.i.h.bf16 %v2750_v42  ;;  %v2751_v53 = vunpack.i.l.bf16 %v2750_v42  ;;  %v3551_v41 = vld [vmem:[%s3964_s3] sm:$0xff] }
 0x1a3   :  { %2613 = vmatpush3.bf16.xpose.msk.msra.mxu0 %vm3200_vm2, %v2608_v31 }
 0x1a4   :  { %2616 = vmatprep.subr.msk.bf16.mxu0 %vm3200_vm2, %v2614_v39  ;;  %v2632_v1 = vpack.c.bf16 %v2752_v44, %v2751_v53 }
 0x1a5   :  { %v1149_v47 = vpop.permute.xlu0 %1148  ;;  %v1147_v49 = vpop.permute.xlu1 %1146 }
 0x1a9   :  { %v1153_v51 = vpop.permute.xlu0 %1152  ;;  %v1151_v54 = vpop.permute.xlu1 %1150 }
 0x1ab   :  { %2619 = vmatpush3.bf16.xpose.msk.msra.mxu0 %vm3200_vm2, %v2614_v39  ;;  %v3546_v39 = vld [vmem:[%s3964_s3 + $0x8] sm:$0xff] }
 0x1ac   :  { %2622 = vmatprep.subr.msk.bf16.mxu0 %vm3200_vm2, %v2620_v50 }
 0x1ad   :  { %v1157_v58 = vpop.permute.xlu0 %1156  ;;  %v1155_v59 = vpop.permute.xlu1 %1154 }
 0x1b1   :  { %v1161_v7 = vpop.permute.xlu0 %1160  ;;  %v1159_v13 = vpop.permute.xlu1 %1158 }
 0x1b3   :  { %2625 = vmatpush3.bf16.xpose.msk.msra.mxu0 %vm3200_vm2, %v2620_v50 }
 0x1b4   :  { %2628 = vmatprep.subr.msk.bf16.mxu0 %vm3200_vm2, %v2626_v0 }
 0x1b5   :  { %v1165_v56 = vpop.permute.xlu0 %1164  ;;  %v1163_v62 = vpop.permute.xlu1 %1162 }
 0x1b9   :  { %v1169_v16 = vpop.permute.xlu0 %1168  ;;  %v1167_v20 = vpop.permute.xlu1 %1166 }
 0x1bb   :  { %2631 = vmatpush3.bf16.xpose.msk.msra.mxu0 %vm3200_vm2, %v2626_v0 }
 0x1bc   :  { %2634 = vmatprep.subr.msk.bf16.mxu0 %vm3200_vm2, %v2632_v1 }
 0x1bd   :  { %v1173_v21 = vpop.permute.xlu0 %1172  ;;  %v1171_v52 = vpop.permute.xlu1 %1170 }
 0x1c1   :  { %v2755_v24 = vpop.permute.xlu0 %2754  ;;  %v1175_v29 = vpop.permute.xlu1 %1174 }
 0x1c2   :  { %v2757_v28 = vunpack.i.h.bf16 %v2755_v24  ;;  %v2756_v3 = vunpack.i.l.bf16 %v2755_v24 }
 0x1c3   :  { %2637 = vmatpush3.bf16.xpose.msk.msra.mxu0 %vm3200_vm2, %v2632_v1 }
 0x1c4   :  { %2638 = vmatprep.subr.bf16.mxu0 %v2921_v2  ;;  %v2639_v32 = vpack.c.bf16 %v2757_v28, %v2756_v3 }
 0x1c5   :  { %v2760_v36 = vpop.permute.xlu1 %2759 }
 0x1c6   :  { %v2762_v37 = vunpack.i.h.bf16 %v2760_v36  ;;  %v2761_v40 = vunpack.i.l.bf16 %v2760_v36  ;;  %v2765_v45 = vpop.permute.xlu0 %2764 }
 0x1c7   :  { %v2767_v5 = vunpack.i.h.bf16 %v2765_v45  ;;  %v2766_v6 = vunpack.i.l.bf16 %v2765_v45  ;;  %v3652_v45 = vld [vmem:[%s3964_s3 + $0x60] sm:$0xff] }
 0x1c8   :  { %v2643_v60 = vpack.c.bf16 %v2762_v37, %v2761_v40  ;;  %v3621_v37 = vld [vmem:[%s3964_s3 + $0x40] sm:$0xff] }
 0x1c9   :  { %v2647_v8 = vpack.c.bf16 %v2767_v5, %v2766_v6  ;;  %v2770_v9 = vpop.permute.xlu1 %2769 }
 0x1ca   :  { %2369 = vmatmul.mubr.msk.f32.vlgmr.msra.gmra.mrb[34].mxu0 %vm565_vm1, %v1147_v49  ;;  %v2772_v10 = vunpack.i.h.bf16 %v2770_v9  ;;  %v2771_v14 = vunpack.i.l.bf16 %v2770_v9  ;;  %v2775_v17 = vpop.permute.xlu0 %2774  ;;  %v3562_v49 = vld [vmem:[%s3964_s3 + $0x18] sm:$0xff] }
 0x1cb   :  { %2371 = vmatprep.mubr.msk.f32.mxu0 %vm565_vm1, %v1149_v47  ;;  %2641 = vmatpush3.bf16.xpose.msk.msra.mxu0 %vm3200_vm2, %v2639_v32  ;;  %v2777_v18 = vunpack.i.h.bf16 %v2775_v17  ;;  %v2776_v19 = vunpack.i.l.bf16 %v2775_v17  ;;  %v3669_v9 = vld [vmem:[%s3964_s3 + $0x78] sm:$0xff] }
 0x1cc   :  { %2642 = vmatprep.subr.bf16.mxu0 %v2921_v2  ;;  %v2651_v15 = vpack.c.bf16 %v2772_v10, %v2771_v14 }
 0x1cd   :  { %v2655_v22 = vpack.c.bf16 %v2777_v18, %v2776_v19  ;;  %v2785_v30 = vpop.permute.xlu1 %2784 }
 0x1ce   :  { %2372 = vmatmul.mubr.msk.f32.gmra.mrb[36].mxu0 %vm565_vm1, %v1151_v54  ;;  %v2780_v23 = vpop.permute.xlu0 %2779  ;;  %v2787_v31 = vunpack.i.h.bf16 %v2785_v30  ;;  %v2786_v33 = vunpack.i.l.bf16 %v2785_v30 }
 0x1cf   :  { %2374 = vmatprep.mubr.msk.f32.mxu0 %vm565_vm1, %v1153_v51  ;;  %v2782_v25 = vunpack.i.h.bf16 %v2780_v23  ;;  %v2781_v26 = vunpack.i.l.bf16 %v2780_v23 }
 0x1d0   :  { %v2663_v34 = vpack.c.bf16 %v2787_v31, %v2786_v33 }
 0x1d1   :  { %v2659_v27 = vpack.c.bf16 %v2782_v25, %v2781_v26 }
 0x1d2   :  { %2375 = vmatmul.mubr.msk.f32.gmra.mrb[38].mxu0 %vm565_vm1, %v1155_v59 }
 0x1d3   :  { %2377 = vmatprep.mubr.msk.f32.mxu0 %vm565_vm1, %v1157_v58  ;;  %2645 = vmatpush3.bf16.xpose.msk.msra.mxu0 %vm3200_vm2, %v2643_v60  ;;  %v3629_v60 = vld [vmem:[%s3964_s3 + $0x58] sm:$0xff] }
 0x1d4   :  { %2646 = vmatprep.subr.bf16.mxu0 %v2921_v2 }
 0x1d6   :  { %2378 = vmatmul.mubr.msk.f32.gmra.mrb[40].mxu0 %vm565_vm1, %v1159_v13  ;;  %v553_v13 = vld [vmem:[%s3964_s3 + $0x28] sm:$0xff] }
 0x1d7   :  { %2380 = vmatprep.mubr.msk.f32.mxu0 %vm565_vm1, %v1161_v7 }
 0x1da   :  { %2381 = vmatmul.mubr.msk.f32.gmra.mrb[42].mxu0 %vm565_vm1, %v1163_v62  ;;  %v3596_v62 = vld [vmem:[%s3964_s3 + $0x38] sm:$0xff] }
 0x1db   :  { %2383 = vmatprep.mubr.msk.f32.mxu0 %vm565_vm1, %v1165_v56  ;;  %2649 = vmatpush3.bf16.xpose.msk.msra.mxu0 %vm3200_vm2, %v2647_v8  ;;  %v3664_v8 = vld [vmem:[%s3964_s3 + $0x68] sm:$0xff] }
 0x1dc   :  { %2650 = vmatprep.subr.bf16.mxu0 %v2921_v2 }
 0x1de   :  { %2384 = vmatmul.mubr.msk.f32.gmra.mrb[44].mxu0 %vm565_vm1, %v1167_v20 }
 0x1df   :  { %2386 = vmatprep.mubr.msk.f32.mxu0 %vm565_vm1, %v1169_v16 }
 0x1e2   :  { %2387 = vmatmul.mubr.msk.f32.gmra.mrb[46].mxu0 %vm565_vm1, %v1171_v52 }
 0x1e3   :  { %2389 = vmatprep.mubr.msk.f32.mxu0 %vm565_vm1, %v1173_v21  ;;  %2653 = vmatpush3.bf16.xpose.msk.msra.mxu0 %vm3200_vm2, %v2651_v15  ;;  %v3605_v21 = vld [vmem:[%s3964_s3 + $0x30] sm:$0xff] }
 0x1e4   :  { %2654 = vmatprep.subr.bf16.mxu0 %v2921_v2  ;;  %v3682_v15 = vld [vmem:[%s3964_s3 + $0x70] sm:$0xff] }
 0x1e6   :  { %2390 = vmatmul.mubr.msk.f32.gmra.mrb[48].mxu0 %vm565_vm1, %v1175_v29 }
 0x1e7   :  { %2424 = vmatprep.mubr.msk.f32.mxu0 %vm2922_vm3, %v2923_v61 }
 0x1eb   :  { %2657 = vmatpush3.bf16.xpose.msk.msra.mxu0 %vm3200_vm2, %v2655_v22 }
 0x1ec   :  { %2658 = vmatprep.subr.bf16.mxu0 %v2921_v2 }
 0x1f3   :  { %2661 = vmatpush3.bf16.xpose.msk.msra.mxu0 %vm3200_vm2, %v2659_v27 }
 0x1f4   :  { %2662 = vmatprep.subr.bf16.mxu0 %v2921_v2 }
 0x1fb   :  { %2665 = vmatpush3.bf16.xpose.msk.msra.mxu0 %vm3200_vm2, %v2663_v34 }
 0x1fc   :  { %2666 = vmatprep.subr.bf16.mxu0 %v2921_v2 }
 0x207   :  { %v3541_v35 = vpop.f32.mrb[32].mxu0 }
 0x208   :  { %v2300_v38 = vpop.f32.mrb[33].mxu0 }
 0x226   :  { %v2244_v42 = vpop.f32.mrb[16].mxu1 }
 0x227   :  { %v3554_v43 = vadd.f32 %v2244_v42, %v3546_v39  ;;  %v728_v46 = vpop.f32.mrb[17].mxu1 }
 0x228   :  { %v3557_v47 = vadd.f32 %v728_v46, %v3551_v41 }
 0x229   :  { %809 = vmax.xlane.f32.xlu0 %v3554_v43 }
 0x22a   :  { %v2247_v50 = vpop.f32.mrb[18].mxu1  ;;  %807 = vmax.xlane.f32.xlu1 %v3557_v47 }
 0x22b   :  { %v3567_v51 = vadd.f32 %v2247_v50, %v3562_v49  ;;  %v738_v54 = vpop.f32.mrb[19].mxu1 }
 0x22c   :  { %v3581_v0 = vadd.f32 %v738_v54, %v3572_v55 }
 0x22e   :  { %v2250_v58 = vpop.f32.mrb[20].mxu1  ;;  %813 = vmax.xlane.f32.xlu1 %v3567_v51 }
 0x22f   :  { %v748_v59 = vpop.f32.mrb[21].mxu1  ;;  %v3591_v56 = vadd.f32 %v2250_v58, %v553_v13 }
 0x230   :  { %v3584_v7 = vadd.f32 %v748_v59, %v3577_v57 }
 0x232   :  { %v2253_v44 = vpop.f32.mrb[22].mxu1  ;;  %815 = vmax.xlane.f32.xlu0 %v3584_v7  ;;  %811 = vmax.xlane.f32.xlu1 %v3581_v0 }
 0x233   :  { %v758_v53 = vpop.f32.mrb[23].mxu1  ;;  %v3600_v20 = vadd.f32 %v2253_v44, %v3596_v62 }
 0x234   :  { %v3609_v28 = vadd.f32 %v758_v53, %v3605_v21 }
 0x236   :  { %v2256_v1 = vpop.f32.mrb[24].mxu1  ;;  %817 = vmax.xlane.f32.xlu1 %v3591_v56 }
 0x237   :  { %v768_v16 = vpop.f32.mrb[25].mxu1 }
 0x238   :  { %v3624_v40 = vadd.f32 %v768_v16, %v3621_v37 }
 0x23a   :  { %v2259_v52 = vpop.f32.mrb[26].mxu1  ;;  %821 = vmax.xlane.f32.xlu1 %v3600_v20 }
 0x23b   :  { %v778_v24 = vpop.f32.mrb[27].mxu1  ;;  %v3633_v63 = vadd.f32 %v2259_v52, %v3629_v60 }
 0x23e   :  { %v2262_v3 = vpop.f32.mrb[28].mxu1  ;;  %819 = vmax.xlane.f32.xlu1 %v3609_v28 }
 0x23f   :  { %v788_v29 = vpop.f32.mrb[29].mxu1  ;;  %v3674_v10 = vadd.f32 %v2262_v3, %v3664_v8 }
 0x240   :  { %v3659_v6 = vadd.f32 %v788_v29, %v3652_v45 }
 0x242   :  { %v2265_v32 = vpop.f32.mrb[30].mxu1 }
 0x243   :  { %v798_v36 = vpop.f32.mrb[31].mxu1  ;;  %v3677_v14 = vadd.f32 %v2265_v32, %v3669_v9 }
 0x244   :  { %v3687_v17 = vadd.f32 %v798_v36, %v3682_v15 }
 0x248   :  { %2789 = vrot.lane.b32.xlu0 %v2788_v11, %s2924_s0  ;;  %v3642_v11 = vadd.f32 %v778_v24, %v3638_v4 }
 0x24f   :  { %1561 = vrot.lane.b32.xlu1 %v3360_v48, %s2924_s0  ;;  %v3647_v48 = vld [vmem:[%s3964_s3 + $0x48] sm:$0xff] }
 0x250   :  { %v3656_v5 = vadd.f32 %v2256_v1, %v3647_v48 }
 0x267   :  { %823 = vmax.xlane.f32.xlu0 %v3624_v40 }
 0x26b   :  { %829 = vmax.xlane.f32.xlu0 %v3633_v63 }
 0x26f   :  { %827 = vmax.xlane.f32.xlu0 %v3642_v11 }
 0x273   :  { %831 = vmax.xlane.f32.xlu0 %v3659_v6  ;;  %825 = vmax.xlane.f32.xlu1 %v3656_v5 }
 0x277   :  { %833 = vmax.xlane.f32.xlu0 %v3674_v10  ;;  %837 = vmax.xlane.f32.xlu1 %v3677_v14 }
 0x27b   :  { %835 = vmax.xlane.f32.xlu0 %v3687_v17 }
 0x29d   :  { %v2370_v18 = vpop.f32.mrb[34].mxu0 }
 0x29e   :  { %v3691_v19 = vadd.f32 %v2370_v18, %v3546_v39  ;;  %v1338_v22 = vpop.f32.mrb[35].mxu0 }
 0x29f   :  { %v3694_v23 = vadd.f32 %v1338_v22, %v3551_v41 }
 0x2a0   :  { %1419 = vmax.xlane.f32.xlu1 %v3691_v19 }
 0x2a1   :  { %v2373_v25 = vpop.f32.mrb[36].mxu0  ;;  %1417 = vmax.xlane.f32.xlu0 %v3694_v23 }
 0x2a2   :  { %v3699_v26 = vadd.f32 %v2373_v25, %v3562_v49  ;;  %v1348_v27 = vpop.f32.mrb[37].mxu0 }
 0x2a3   :  { %v3702_v30 = vadd.f32 %v1348_v27, %v3572_v55 }
 0x2a4   :  { %1423 = vmax.xlane.f32.xlu1 %v3699_v26 }
 0x2a5   :  { %v2376_v31 = vpop.f32.mrb[38].mxu0  ;;  %1421 = vmax.xlane.f32.xlu0 %v3702_v30 }
 0x2a6   :  { %v3706_v33 = vadd.f32 %v2376_v31, %v553_v13  ;;  %v1358_v34 = vpop.f32.mrb[39].mxu0 }
 0x2a7   :  { %v3709_v38 = vadd.f32 %v1358_v34, %v3577_v57 }
 0x2a8   :  { %1427 = vmax.xlane.f32.xlu1 %v3706_v33 }
 0x2a9   :  { %v2379_v39 = vpop.f32.mrb[40].mxu0  ;;  %1425 = vmax.xlane.f32.xlu0 %v3709_v38 }
 0x2aa   :  { %v1368_v41 = vpop.f32.mrb[41].mxu0 }
 0x2ad   :  { %v2382_v42 = vpop.f32.mrb[42].mxu0 }
 0x2ae   :  { %v1378_v46 = vpop.f32.mrb[43].mxu0 }
 0x2b1   :  { %v3713_v49 = vpop.f32.mrb[44].mxu0 }
 0x2b2   :  { %v3715_v50 = vpop.f32.mrb[45].mxu0 }
 0x2b5   :  { %v3717_v54 = vpop.f32.mrb[46].mxu0 }
 0x2b6   :  { %v3719_v55 = vpop.f32.mrb[47].mxu0  ;;  %v810_v58 = vpop.xlane.xlu0 %809 }
 0x2b7   :  { %v840_v57 = vsub.f32 %v3554_v43, %v810_v58  ;;  %v808_v59 = vpop.xlane.xlu1 %807 }
 0x2b8   :  { %v839_v13 = vsub.f32 %v3557_v47, %v808_v59  ;;  %v3738_v59 = vadd.f32 %v2379_v39, %v3596_v62 }
 0x2b9   :  { %v857_v44 = vmul.f32 1.442695, %v840_v57  ;;  %v3723_v53 = vpop.f32.mrb[48].mxu0 }
 0x2ba   :  { %v855_v1 = vmul.f32 1.442695, %v839_v13  ;;  %v3725_v16 = vpop.f32.mrb[49].mxu0 }
 0x2bb   :  { %2793 = vpow2.f32 %v857_v44  ;;  %v814_v52 = vpop.xlane.xlu1 %813 }
 0x2bc   :  { %2795 = vpow2.f32 %v855_v1  ;;  %v842_v24 = vsub.f32 %v3567_v51, %v814_v52  ;;  %v3760_v52 = vadd.f32 %v1378_v46, %v3621_v37  ;;  %v3776_v37 = vadd.f32 %v3715_v50, %v3638_v4 }
 0x2bd   :  { %v3792_v4 = vadd.f32 %v3719_v55, %v3652_v45 }
 0x2be   :  { %v861_v3 = vmul.f32 1.442695, %v842_v24 }
 0x2bf   :  { %v816_v29 = vpop.xlane.xlu0 %815  ;;  %v812_v32 = vpop.xlane.xlu1 %811 }
 0x2c0   :  { %v841_v36 = vsub.f32 %v3581_v0, %v812_v32  ;;  %2797 = vpow2.f32 %v861_v3  ;;  %v843_v34 = vsub.f32 %v3584_v7, %v816_v29 }
 0x2c2   :  { %v859_v43 = vmul.f32 1.442695, %v841_v36  ;;  %v863_v7 = vmul.f32 1.442695, %v843_v34 }
 0x2c3   :  { %v2790_v18 = vpop.permute.xlu0 %2789  ;;  %v818_v47 = vpop.xlane.xlu1 %817 }
 0x2c4   :  { %v2792_v22 = vunpack.i.h.bf16 %v2790_v18  ;;  %v2791_v25 = vunpack.i.l.bf16 %v2790_v18  ;;  %v844_v27 = vsub.f32 %v3591_v56, %v818_v47  ;;  %2799 = vpow2.f32 %v859_v43 }
 0x2c5   :  { %v3730_v31 = vpop.eup %2793  ;;  %v3743_v56 = vadd.f32 %v1368_v41, %v3605_v21  ;;  %v3755_v41 = vadd.f32 %v2382_v42, %v3647_v48  ;;  %v3771_v42 = vadd.f32 %v3713_v49, %v3629_v60  ;;  %v3787_v60 = vadd.f32 %v3717_v54, %v3664_v8 }
 0x2c6   :  { %v3733_v58 = vpop.eup %2795  ;;  %v2667_v51 = vpack.c.bf16 %v2792_v22, %v2791_v25  ;;  %889 = vadd.xlane.f32.xlu1 %v3730_v31  ;;  %v865_v57 = vmul.f32 1.442695, %v844_v27 }
 0x2c7   :  { %887 = vadd.xlane.f32.xlu0 %v3733_v58  ;;  %v822_v0 = vpop.xlane.xlu1 %821 }
 0x2c8   :  { %2669 = vmatpush3.bf16.xpose.msk.msra.mxu0 %vm3200_vm2, %v2667_v51  ;;  %2801 = vpow2.f32 %v865_v57  ;;  %v846_v13 = vsub.f32 %v3600_v20, %v822_v0 }
 0x2c9   :  { %2803 = vpow2.f32 %v863_v7 }
 0x2ca   :  { %1431 = vmax.xlane.f32.xlu1 %v3738_v59  ;;  %v3748_v1 = vpop.eup %2797  ;;  %v869_v21 = vmul.f32 1.442695, %v846_v13 }
 0x2cb   :  { %1429 = vmax.xlane.f32.xlu0 %v3743_v56  ;;  %v820_v44 = vpop.xlane.xlu1 %819 }
 0x2cc   :  { %v845_v62 = vsub.f32 %v3609_v28, %v820_v44  ;;  %2805 = vpow2.f32 %v869_v21 }
 0x2ce   :  { %893 = vadd.xlane.f32.xlu1 %v3748_v1  ;;  %v3752_v12 = vpop.eup %2799  ;;  %v867_v20 = vmul.f32 1.442695, %v845_v62 }
 0x2cf   :  { %v1562_v39 = vpop.permute.xlu1 %1561  ;;  %891 = vadd.xlane.f32.xlu0 %v3752_v12 }
 0x2d0   :  { %2425 = vmatmul.mubr.msk.f32.vlgmr.msra.gmra.mrb[50].mxu0 %vm565_vm1, %v1562_v39  ;;  %2807 = vpow2.f32 %v867_v20 }
 0x2d2   :  { %1435 = vmax.xlane.f32.xlu1 %v3755_v41  ;;  %v3764_v28 = vpop.eup %2801 }
 0x2d3   :  { %1433 = vmax.xlane.f32.xlu0 %v3760_v52  ;;  %v3767_v48 = vpop.eup %2803 }
 0x2d6   :  { %897 = vadd.xlane.f32.xlu1 %v3764_v28  ;;  %v3780_v46 = vpop.eup %2805 }
 0x2d7   :  { %895 = vadd.xlane.f32.xlu0 %v3767_v48 }
 0x2da   :  { %1439 = vmax.xlane.f32.xlu1 %v3771_v42  ;;  %v3783_v24 = vpop.eup %2807 }
 0x2db   :  { %1437 = vmax.xlane.f32.xlu0 %v3776_v37 }
 0x2de   :  { %901 = vadd.xlane.f32.xlu1 %v3780_v46 }
 0x2df   :  { %899 = vadd.xlane.f32.xlu0 %v3783_v24 }
 0x2e2   :  { %1443 = vmax.xlane.f32.xlu1 %v3787_v60 }
 0x2e3   :  { %1441 = vmax.xlane.f32.xlu0 %v3792_v4 }
 0x2f4   :  { %v824_v49 = vpop.xlane.xlu0 %823 }
 0x2f5   :  { %v847_v50 = vsub.f32 %v3624_v40, %v824_v49  ;;  %v3805_v40 = vadd.f32 %v3725_v16, %v3682_v15 }
 0x2f7   :  { %v871_v3 = vmul.f32 1.442695, %v847_v50 }
 0x2f8   :  { %v830_v29 = vpop.xlane.xlu0 %829 }
 0x2f9   :  { %2809 = vpow2.f32 %v871_v3 }
 0x2fc   :  { %v828_v32 = vpop.xlane.xlu0 %827 }
 0x2fd   :  { %v849_v8 = vsub.f32 %v3642_v11, %v828_v32  ;;  %v850_v11 = vsub.f32 %v3633_v63, %v830_v29 }
 0x2ff   :  { %v875_v54 = vmul.f32 1.442695, %v849_v8 }
 0x300   :  { %v832_v36 = vpop.xlane.xlu0 %831  ;;  %v826_v43 = vpop.xlane.xlu1 %825 }
 0x301   :  { %2811 = vpow2.f32 %v875_v54  ;;  %v851_v45 = vsub.f32 %v3659_v6, %v832_v36  ;;  %v848_v55 = vsub.f32 %v3656_v5, %v826_v43  ;;  %v877_v6 = vmul.f32 1.442695, %v850_v11 }
 0x303   :  { %v3800_v18 = vpop.eup %2809  ;;  %v879_v47 = vmul.f32 1.442695, %v851_v45  ;;  %v873_v22 = vmul.f32 1.442695, %v848_v55 }
 0x304   :  { %v834_v25 = vpop.xlane.xlu0 %833  ;;  %903 = vadd.xlane.f32.xlu0 %v3800_v18  ;;  %v838_v57 = vpop.xlane.xlu1 %837 }
 0x305   :  { %2813 = vpow2.f32 %v879_v47  ;;  %v852_v34 = vsub.f32 %v3674_v10, %v834_v25  ;;  %v854_v63 = vsub.f32 %v3677_v14, %v838_v57 }
 0x306   :  { %2815 = vpow2.f32 %v873_v22 }
 0x307   :  { %v881_v15 = vmul.f32 1.442695, %v852_v34  ;;  %v885_v10 = vmul.f32 1.442695, %v854_v63 }
 0x308   :  { %v836_v27 = vpop.xlane.xlu0 %835  ;;  %1445 = vmax.xlane.f32.xlu0 %v3805_v40 }
 0x309   :  { %v853_v5 = vsub.f32 %v3687_v17, %v836_v27  ;;  %v3823_v17 = vadd.f32 %v3723_v53, %v3669_v9 }
 0x30b   :  { %v3811_v51 = vpop.eup %2811  ;;  %v883_v0 = vmul.f32 1.442695, %v853_v5 }
 0x30c   :  { %907 = vadd.xlane.f32.xlu0 %v3811_v51 }
 0x30d   :  { %2817 = vpow2.f32 %v883_v0 }
 0x30e   :  { %2819 = vpow2.f32 %v877_v6 }
 0x30f   :  { %v3815_v16 = vpop.eup %2813  ;;  %2821 = vpow2.f32 %v881_v15 }
 0x310   :  { %v3817_v7 = vpop.eup %2815  ;;  %911 = vadd.xlane.f32.xlu0 %v3815_v16  ;;  %2823 = vpow2.f32 %v885_v10 }
 0x311   :  { %905 = vadd.xlane.f32.xlu1 %v3817_v7 }
 0x315   :  { %1447 = vmax.xlane.f32.xlu1 %v3823_v17 }
 0x317   :  { %v3826_v13 = vpop.eup %2817 }
 0x318   :  { %v3828_v14 = vpop.eup %2819  ;;  %915 = vadd.xlane.f32.xlu0 %v3826_v13 }
 0x319   :  { %909 = vadd.xlane.f32.xlu1 %v3828_v14  ;;  %v3832_v44 = vpop.eup %2821 }
 0x31a   :  { %v3835_v62 = vpop.eup %2823 }
 0x31d   :  { %913 = vadd.xlane.f32.xlu1 %v3832_v44 }
 0x321   :  { %917 = vadd.xlane.f32.xlu1 %v3835_v62 }
 0x32d   :  { %v1420_v9 = vpop.xlane.xlu1 %1419 }
 0x32e   :  { %v1450_v53 = vsub.f32 %v3691_v19, %v1420_v9  ;;  %v1418_v21 = vpop.xlane.xlu0 %1417 }
 0x32f   :  { %v1449_v39 = vsub.f32 %v3694_v23, %v1418_v21 }
 0x330   :  { %v1467_v20 = vmul.f32 1.442695, %v1450_v53 }
 0x331   :  { %v1465_v49 = vmul.f32 1.442695, %v1449_v39  ;;  %v1424_v50 = vpop.xlane.xlu1 %1423 }
 0x332   :  { %2825 = vpow2.f32 %v1467_v20  ;;  %v1452_v3 = vsub.f32 %v3699_v26, %v1424_v50  ;;  %v1422_v29 = vpop.xlane.xlu0 %1421 }
 0x333   :  { %2827 = vpow2.f32 %v1465_v49  ;;  %v1451_v32 = vsub.f32 %v3702_v30, %v1422_v29 }
 0x334   :  { %v1471_v8 = vmul.f32 1.442695, %v1452_v3 }
 0x335   :  { %v1469_v54 = vmul.f32 1.442695, %v1451_v32  ;;  %v1428_v36 = vpop.xlane.xlu1 %1427 }
 0x336   :  { %2829 = vpow2.f32 %v1471_v8  ;;  %v1454_v43 = vsub.f32 %v3706_v33, %v1428_v36  ;;  %v1426_v19 = vpop.xlane.xlu0 %1425 }
 0x337   :  { %2831 = vpow2.f32 %v1469_v54  ;;  %v1453_v23 = vsub.f32 %v3709_v38, %v1426_v19 }
 0x338   :  { %v1475_v45 = vmul.f32 1.442695, %v1454_v43 }
 0x339   :  { %v1473_v55 = vmul.f32 1.442695, %v1453_v23 }
 0x33a   :  { %2833 = vpow2.f32 %v1475_v45 }
 0x33b   :  { %2835 = vpow2.f32 %v1473_v55 }
 0x33c   :  { %v3844_v47 = vpop.eup %2825 }
 0x33d   :  { %v3846_v26 = vpop.eup %2827  ;;  %1499 = vadd.xlane.f32.xlu1 %v3844_v47 }
 0x33e   :  { %1497 = vadd.xlane.f32.xlu0 %v3846_v26 }
 0x340   :  { %v3850_v30 = vpop.eup %2829 }
 0x341   :  { %v3852_v22 = vpop.eup %2831  ;;  %1503 = vadd.xlane.f32.xlu1 %v3850_v30 }
 0x342   :  { %1501 = vadd.xlane.f32.xlu0 %v3852_v22 }
 0x344   :  { %v3856_v33 = vpop.eup %2833 }
 0x345   :  { %v3858_v38 = vpop.eup %2835  ;;  %1507 = vadd.xlane.f32.xlu1 %v3856_v33 }
 0x346   :  { %1505 = vadd.xlane.f32.xlu0 %v3858_v38 }
 0x353   :  { %v890_v25 = vpop.xlane.xlu1 %889 }
 0x354   :  { %2837 = vrcp.f32 %v890_v25  ;;  %v888_v11 = vpop.xlane.xlu0 %887 }
 0x355   :  { %2839 = vrcp.f32 %v888_v11 }
 0x357   :  { %v1432_v27 = vpop.xlane.xlu1 %1431 }
 0x358   :  { %v1456_v5 = vsub.f32 %v3738_v59, %v1432_v27  ;;  %v1430_v6 = vpop.xlane.xlu0 %1429 }
 0x359   :  { %v1455_v34 = vsub.f32 %v3743_v56, %v1430_v6 }
 0x35a   :  { %v1479_v57 = vmul.f32 1.442695, %v1456_v5 }
 0x35b   :  { %v1477_v0 = vmul.f32 1.442695, %v1455_v34  ;;  %v894_v15 = vpop.xlane.xlu1 %893 }
 0x35c   :  { %2841 = vpow2.f32 %v1479_v57  ;;  %v892_v63 = vpop.xlane.xlu0 %891 }
 0x35d   :  { %2843 = vpow2.f32 %v1477_v0 }
 0x35e   :  { %v2838_v10 = vpop.eup %2837  ;;  %2845 = vrcp.f32 %v894_v15 }
 0x35f   :  { %v2840_v9 = vpop.eup %2839  ;;  %2847 = vrcp.f32 %v892_v63  ;;  %v1436_v53 = vpop.xlane.xlu1 %1435  ;;  %v936_v21 = vmul.f32 %v2838_v10, %v3730_v31 }
 0x360   :  { %v1458_v39 = vsub.f32 %v3755_v41, %v1436_v53  ;;  %v935_v59 = vmul.f32 %v2840_v9, %v3733_v58  ;;  %v1434_v20 = vpop.xlane.xlu0 %1433 }
 0x361   :  { %v1457_v56 = vsub.f32 %v3760_v52, %v1434_v20 }
 0x362   :  { %v1483_v49 = vmul.f32 1.442695, %v1458_v39  ;;  %v2567_v50 = vpack.c.bf16 %v936_v21, %v935_v59 }
 0x363   :  { %v898_v3 = vpop.xlane.xlu1 %897  ;;  %v1481_v29 = vmul.f32 1.442695, %v1457_v56 }
 0x364   :  { %2849 = vpow2.f32 %v1483_v49  ;;  %2568 = vmatpush3.bf16.xpose.msra.mxu1 %v2567_v50  ;;  %v896_v32 = vpop.xlane.xlu0 %895 }
 0x365   :  { %2851 = vrcp.f32 %v898_v3  ;;  %2569 = vmatprep.subr.bf16.mxu1 %v2921_v2 }
 0x366   :  { %v3869_v8 = vpop.eup %2841  ;;  %2853 = vpow2.f32 %v1481_v29 }
 0x367   :  { %v3871_v31 = vpop.eup %2843  ;;  %2855 = vrcp.f32 %v896_v32  ;;  %1511 = vadd.xlane.f32.xlu1 %v3869_v8  ;;  %v1440_v58 = vpop.xlane.xlu1 %1439 }
 0x368   :  { %v2846_v41 = vpop.eup %2845  ;;  %v1460_v52 = vsub.f32 %v3771_v42, %v1440_v58  ;;  %1509 = vadd.xlane.f32.xlu0 %v3871_v31  ;;  %v1438_v36 = vpop.xlane.xlu0 %1437 }
 0x369   :  { %v2848_v54 = vpop.eup %2847  ;;  %v938_v43 = vmul.f32 %v2846_v41, %v3748_v1  ;;  %v1459_v23 = vsub.f32 %v3776_v37, %v1438_v36 }
 0x36a   :  { %v1487_v19 = vmul.f32 1.442695, %v1460_v52  ;;  %v937_v45 = vmul.f32 %v2848_v54, %v3752_v12 }
 0x36b   :  { %v902_v55 = vpop.xlane.xlu1 %901  ;;  %v1485_v25 = vmul.f32 1.442695, %v1459_v23 }
 0x36c   :  { %2857 = vpow2.f32 %v1487_v19  ;;  %v2570_v11 = vpack.c.bf16 %v938_v43, %v937_v45  ;;  %v900_v27 = vpop.xlane.xlu0 %899 }
 0x36d   :  { %2859 = vrcp.f32 %v902_v55 }
 0x36e   :  { %v3879_v5 = vpop.eup %2849  ;;  %2861 = vpow2.f32 %v1485_v25  ;;  %2571 = vmatpush3.bf16.xpose.msra.mxu1 %v2570_v11 }
 0x36f   :  { %v2852_v42 = vpop.eup %2851  ;;  %2863 = vrcp.f32 %v900_v27  ;;  %1515 = vadd.xlane.f32.xlu1 %v3879_v5  ;;  %v1444_v1 = vpop.xlane.xlu1 %1443  ;;  %2572 = vmatprep.subr.bf16.mxu1 %v2921_v2 }
 0x370   :  { %v3883_v37 = vpop.eup %2853  ;;  %v1462_v12 = vsub.f32 %v3787_v60, %v1444_v1  ;;  %v940_v6 = vmul.f32 %v2852_v42, %v3764_v28  ;;  %v1442_v57 = vpop.xlane.xlu0 %1441 }
 0x371   :  { %v2856_v34 = vpop.eup %2855  ;;  %1513 = vadd.xlane.f32.xlu0 %v3883_v37  ;;  %v1461_v15 = vsub.f32 %v3792_v4, %v1442_v57 }
 0x372   :  { %v1491_v0 = vmul.f32 1.442695, %v1462_v12  ;;  %v939_v63 = vmul.f32 %v2856_v34, %v3767_v48 }
 0x373   :  { %v1489_v10 = vmul.f32 1.442695, %v1461_v15 }
 0x374   :  { %2865 = vpow2.f32 %v1491_v0  ;;  %v2573_v9 = vpack.c.bf16 %v940_v6, %v939_v63 }
 0x375   :  { %2867 = vpow2.f32 %v1489_v10 }
 0x376   :  { %v3890_v53 = vpop.eup %2857  ;;  %2574 = vmatpush3.bf16.xpose.msra.mxu1 %v2573_v9 }
 0x377   :  { %v2860_v21 = vpop.eup %2859  ;;  %1519 = vadd.xlane.f32.xlu1 %v3890_v53  ;;  %2575 = vmatprep.subr.bf16.mxu1 %v2921_v2 }
 0x378   :  { %v3894_v28 = vpop.eup %2861  ;;  %v942_v60 = vmul.f32 %v2860_v21, %v3780_v46 }
 0x379   :  { %v2864_v39 = vpop.eup %2863  ;;  %1517 = vadd.xlane.f32.xlu0 %v3894_v28 }
 0x37a   :  { %v941_v48 = vmul.f32 %v2864_v39, %v3783_v24 }
 0x37c   :  { %v2576_v4 = vpack.c.bf16 %v942_v60, %v941_v48 }
 0x37e   :  { %v3899_v59 = vpop.eup %2865  ;;  %2577 = vmatpush3.bf16.xpose.msra.mxu1 %v2576_v4 }
 0x37f   :  { %1523 = vadd.xlane.f32.xlu1 %v3899_v59  ;;  %2578 = vmatprep.subr.bf16.mxu1 %v2921_v2  ;;  %v3903_v20 = vpop.eup %2867 }
 0x380   :  { %1521 = vadd.xlane.f32.xlu0 %v3903_v20 }
 0x391   :  { %v904_v49 = vpop.xlane.xlu0 %903 }
 0x395   :  { %v1446_v56 = vpop.xlane.xlu0 %1445 }
 0x396   :  { %v1463_v46 = vsub.f32 %v3805_v40, %v1446_v56 }
 0x398   :  { %v1493_v50 = vmul.f32 1.442695, %v1463_v46 }
 0x399   :  { %v908_v29 = vpop.xlane.xlu0 %907 }
 0x39a   :  { %2869 = vpow2.f32 %v1493_v50 }
 0x39b   :  { %2871 = vrcp.f32 %v904_v49 }
 0x39e   :  { %v906_v24 = vpop.xlane.xlu1 %905 }
 0x39f   :  { %2873 = vrcp.f32 %v906_v24 }
 0x3a0   :  { %2875 = vrcp.f32 %v908_v29 }
 0x3a2   :  { %v1448_v3 = vpop.xlane.xlu1 %1447 }
 0x3a3   :  { %v1464_v32 = vsub.f32 %v3823_v17, %v1448_v3  ;;  %v3908_v58 = vpop.f32.mrb[50].mxu0  ;;  %v912_v17 = vpop.xlane.xlu0 %911 }
 0x3a4   :  { %v3910_v41 = vpop.eup %2869  ;;  %v2426_v52 = vpop.f32.mrb[51].mxu0 }
 0x3a5   :  { %v1495_v54 = vmul.f32 1.442695, %v1464_v32  ;;  %1525 = vadd.xlane.f32.xlu0 %v3910_v41  ;;  %v2872_v40 = vpop.eup %2871 }
 0x3a6   :  { %v910_v36 = vpop.xlane.xlu1 %909  ;;  %v943_v23 = vmul.f32 %v2872_v40, %v3800_v18 }
 0x3a7   :  { %2877 = vpow2.f32 %v1495_v54  ;;  %v916_v1 = vpop.xlane.xlu0 %915 }
 0x3a8   :  { %2879 = vrcp.f32 %v910_v36 }
 0x3a9   :  { %v2874_v43 = vpop.eup %2873 }
 0x3aa   :  { %v914_v19 = vpop.xlane.xlu1 %913  ;;  %v944_v45 = vmul.f32 %v2874_v43, %v3817_v7  ;;  %v2876_v25 = vpop.eup %2875 }
 0x3ab   :  { %2881 = vrcp.f32 %v914_v19  ;;  %v945_v12 = vmul.f32 %v2876_v25, %v3811_v51 }
 0x3ac   :  { %v2579_v55 = vpack.c.bf16 %v944_v45, %v943_v23  ;;  %2883 = vrcp.f32 %v912_v17 }
 0x3ae   :  { %2580 = vmatpush3.bf16.xpose.msra.mxu1 %v2579_v55  ;;  %v918_v27 = vpop.xlane.xlu1 %917 }
 0x3af   :  { %2581 = vmatprep.subr.bf16.mxu1 %v2921_v2  ;;  %2885 = vrcp.f32 %v918_v27 }
 0x3b0   :  { %2887 = vrcp.f32 %v916_v1 }
 0x3b1   :  { %v3916_v11 = vpop.eup %2877 }
 0x3b2   :  { %v2880_v42 = vpop.eup %2879  ;;  %1527 = vadd.xlane.f32.xlu1 %v3916_v11 }
 0x3b3   :  { %v946_v18 = vmul.f32 %v2880_v42, %v3828_v14 }
 0x3b5   :  { %v2582_v7 = vpack.c.bf16 %v946_v18, %v945_v12  ;;  %v2882_v6 = vpop.eup %2881 }
 0x3b6   :  { %v2884_v34 = vpop.eup %2883  ;;  %v948_v57 = vmul.f32 %v2882_v6, %v3832_v44 }
 0x3b7   :  { %2583 = vmatpush3.bf16.xpose.msra.mxu1 %v2582_v7  ;;  %v947_v0 = vmul.f32 %v2884_v34, %v3815_v16 }
 0x3b8   :  { %2584 = vmatprep.subr.bf16.mxu1 %v2921_v2 }
 0x3b9   :  { %v2585_v15 = vpack.c.bf16 %v948_v57, %v947_v0  ;;  %v2886_v63 = vpop.eup %2885 }
 0x3ba   :  { %v2888_v10 = vpop.eup %2887  ;;  %v950_v51 = vmul.f32 %v2886_v63, %v3835_v62 }
 0x3bb   :  { %v949_v14 = vmul.f32 %v2888_v10, %v3826_v13 }
 0x3bd   :  { %v2588_v9 = vpack.c.bf16 %v950_v51, %v949_v14 }
 0x3bf   :  { %2586 = vmatpush3.bf16.xpose.msra.mxu1 %v2585_v15 }
 0x3c0   :  { %2587 = vmatprep.subr.bf16.mxu1 %v2921_v2 }
 0x3c7   :  { %2589 = vmatpush3.bf16.xpose.msra.mxu1 %v2588_v9 }
 0x3c8   :  { %2670 = vmatprep.subr.bf16.mxu1 %v2921_v2 }
 0x3ca   :  { %v1500_v21 = vpop.xlane.xlu1 %1499 }
 0x3cb   :  { %2889 = vrcp.f32 %v1500_v21  ;;  %v1498_v60 = vpop.xlane.xlu0 %1497 }
 0x3cc   :  { %2891 = vrcp.f32 %v1498_v60 }
 0x3ce   :  { %2334 = vmatmul.mubr.f32.vlgmr.msra.gmra.mrb[32].mxu1 %v3541_v35  ;;  %v1504_v16 = vpop.xlane.xlu1 %1503 }
 0x3cf   :  { %2893 = vrcp.f32 %v1504_v16  ;;  %v1502_v44 = vpop.xlane.xlu0 %1501  ;;  %2459 = vmatprep.mubr.msk.f32.mxu1 %vm2922_vm3, %v2923_v61 }
 0x3d0   :  { %2895 = vrcp.f32 %v1502_v44 }
 0x3d2   :  { %v1508_v62 = vpop.xlane.xlu1 %1507 }
 0x3d3   :  { %v1506_v13 = vpop.xlane.xlu0 %1505  ;;  %2897 = vrcp.f32 %v1508_v62 }
 0x3d4   :  { %2899 = vrcp.f32 %v1506_v13 }
 0x3d5   :  { %v2890_v39 = vpop.eup %2889 }
 0x3d6   :  { %v2892_v48 = vpop.eup %2891  ;;  %v1546_v4 = vmul.f32 %v2890_v39, %v3844_v47 }
 0x3d7   :  { %v1545_v49 = vmul.f32 %v2892_v48, %v3846_v26 }
 0x3d9   :  { %v2894_v56 = vpop.eup %2893  ;;  %v2671_v46 = vpack.c.bf16 %v1546_v4, %v1545_v49 }
 0x3da   :  { %v2896_v35 = vpop.eup %2895  ;;  %v1548_v61 = vmul.f32 %v2894_v56, %v3850_v30 }
 0x3db   :  { %2672 = vmatpush3.bf16.xpose.msra.mxu1 %v2671_v46  ;;  %v1547_v50 = vmul.f32 %v2896_v35, %v3852_v22 }
 0x3dc   :  { %2673 = vmatprep.subr.bf16.mxu1 %v2921_v2 }
 0x3dd   :  { %v2898_v24 = vpop.eup %2897  ;;  %v2674_v3 = vpack.c.bf16 %v1548_v61, %v1547_v50 }
 0x3de   :  { %v2900_v29 = vpop.eup %2899  ;;  %v1550_v26 = vmul.f32 %v2898_v24, %v3856_v33 }
 0x3df   :  { %v1549_v47 = vmul.f32 %v2900_v29, %v3858_v38 }
 0x3e1   :  { %v2677_v32 = vpack.c.bf16 %v1550_v26, %v1549_v47 }
 0x3e3   :  { %2675 = vmatpush3.bf16.xpose.msra.mxu1 %v2674_v3 }
 0x3e4   :  { %2676 = vmatprep.subr.bf16.mxu1 %v2921_v2 }
 0x3eb   :  { %2678 = vmatpush3.bf16.xpose.msra.mxu1 %v2677_v32 }
 0x3ec   :  { %2679 = vmatprep.subr.bf16.mxu1 %v2921_v2 }
 0x3f4   :  { %v1512_v52 = vpop.xlane.xlu1 %1511 }
 0x3f5   :  { %2901 = vrcp.f32 %v1512_v52  ;;  %v1510_v54 = vpop.xlane.xlu0 %1509 }
 0x3f6   :  { %2903 = vrcp.f32 %v1510_v54 }
 0x3fc   :  { %v1516_v22 = vpop.xlane.xlu1 %1515 }
 0x3fd   :  { %2905 = vrcp.f32 %v1516_v22 }
 0x3fe   :  { %v1514_v30 = vpop.xlane.xlu0 %1513 }
 0x3ff   :  { %v2902_v36 = vpop.eup %2901  ;;  %2907 = vrcp.f32 %v1514_v30 }
 0x400   :  { %v2904_v40 = vpop.eup %2903  ;;  %v1552_v43 = vmul.f32 %v2902_v36, %v3869_v8 }
 0x401   :  { %v1551_v38 = vmul.f32 %v2904_v40, %v3871_v31 }
 0x403   :  { %v2680_v19 = vpack.c.bf16 %v1552_v43, %v1551_v38 }
 0x404   :  { %v1520_v33 = vpop.xlane.xlu1 %1519 }
 0x405   :  { %2909 = vrcp.f32 %v1520_v33  ;;  %2681 = vmatpush3.bf16.xpose.msra.mxu1 %v2680_v19 }
 0x406   :  { %v1518_v23 = vpop.xlane.xlu0 %1517  ;;  %2682 = vmatprep.subr.bf16.mxu1 %v2921_v2 }
 0x407   :  { %v2906_v45 = vpop.eup %2905  ;;  %2911 = vrcp.f32 %v1518_v23 }
 0x408   :  { %v1554_v17 = vmul.f32 %v2906_v45, %v3879_v5 }
 0x409   :  { %v2908_v55 = vpop.eup %2907 }
 0x40a   :  { %v1553_v25 = vmul.f32 %v2908_v55, %v3883_v37 }
 0x40c   :  { %v1524_v27 = vpop.xlane.xlu1 %1523  ;;  %v2683_v42 = vpack.c.bf16 %v1554_v17, %v1553_v25 }
 0x40d   :  { %2913 = vrcp.f32 %v1524_v27  ;;  %v1522_v8 = vpop.xlane.xlu0 %1521 }
 0x40e   :  { %2684 = vmatpush3.bf16.xpose.msra.mxu1 %v2683_v42  ;;  %2915 = vrcp.f32 %v1522_v8 }
 0x40f   :  { %v2910_v31 = vpop.eup %2909  ;;  %2685 = vmatprep.subr.bf16.mxu1 %v2921_v2 }
 0x410   :  { %v1556_v1 = vmul.f32 %v2910_v31, %v3890_v53 }
 0x411   :  { %v2912_v12 = vpop.eup %2911 }
 0x412   :  { %v1555_v18 = vmul.f32 %v2912_v12, %v3894_v28 }
 0x414   :  { %v2686_v7 = vpack.c.bf16 %v1556_v1, %v1555_v18 }
 0x416   :  { %2687 = vmatpush3.bf16.xpose.msra.mxu1 %v2686_v7 }
 0x417   :  { %v2914_v5 = vpop.eup %2913  ;;  %2688 = vmatprep.subr.bf16.mxu1 %v2921_v2 }
 0x418   :  { %v1558_v37 = vmul.f32 %v2914_v5, %v3899_v59  ;;  %v2916_v6 = vpop.eup %2915  ;;  %v564_v59 = vld [vmem:[%s3963_s2 + $0x2] sm:$0x1] }
 0x419   :  { %v1557_v34 = vmul.f32 %v2916_v6, %v3903_v20 }
 0x41b   :  { %v2689_v57 = vpack.c.bf16 %v1558_v37, %v1557_v34 }
 0x41e   :  { %2690 = vmatpush3.bf16.xpose.msra.mxu1 %v2689_v57 }
 0x41f   :  { %2691 = vmatprep.subr.bf16.mxu1 %v2921_v2 }
 0x432   :  { %v1526_v0 = vpop.xlane.xlu0 %1525 }
 0x433   :  { %2917 = vrcp.f32 %v1526_v0 }
 0x43d   :  { %v2918_v15 = vpop.eup %2917 }
 0x43e   :  { %v1559_v63 = vmul.f32 %v2918_v15, %v3910_v41 }
 0x43f   :  { %v1528_v53 = vpop.xlane.xlu1 %1527 }
 0x440   :  { %2919 = vrcp.f32 %v1528_v53 }
 0x44a   :  { %v2920_v28 = vpop.eup %2919 }
 0x44b   :  { %v1560_v10 = vmul.f32 %v2920_v28, %v3916_v11 }
 0x44d   :  { %v2692_v51 = vpack.c.bf16 %v1560_v10, %v1559_v63 }
 0x44f   :  { %2693 = vmatpush3.bf16.xpose.msra.mxu1 %v2692_v51 }
 0x456   :  { %2460 = vmatmul.mubr.f32.vlgmr.msra.gmra.mrb[32].mxu1 %v3908_v58 }
 0x529   :  { %v1765_v20 = vpop.f32.mrb[32].mxu1 }
 0x52a   :  { %v2706_v2 = vadd.f32 %v1765_v20, %v564_v59  ;;  %v2461_v14 = vpop.f32.mrb[33].mxu1 }
 0x52c   :  { %1770 = vst [vmem:[%s3965_s4] sm:$0x1] %v2706_v2 }

</bundles_post_ra>
